<compile_context>
chip_gen: v6e
topology: v6e:2x2x1
jax: 0.10.0
libtpu: 0.0.40
codegen_flags: <defaults>
</compile_context>

<pallas_src>
import jax
import jax.numpy as jnp
import numpy as np
from jax import lax
from jax.experimental import pallas as pl
from jax.experimental.pallas import tpu as pltpu


# ----------------------------------------------------------------------------
# Pallas kernel: whole recurrence + masked batched output projection.
# ----------------------------------------------------------------------------
def _caption_lstm_kernel(caplen_ref, gx1_ref, whh1_ref, w2_ref, b2_ref,
                         wlin_ref, blin_ref, out_ref, h_all):
    """
    caplen_ref: (B, 1)   int32 caption lengths (incl. feature token)
    gx1_ref   : (T, B, 4H)  precomputed x @ W_ih1 + b1   (non-recurrent part)
    whh1_ref  : (H, 4H)     layer-1 recurrent weight
    w2_ref    : (2H, 4H)    fused [W_ih2 ; W_hh2]
    b2_ref    : (1, 4H)
    wlin_ref  : (H, V), blin_ref: (1, V)
    out_ref   : (T, B, V)   time-major logits
    h_all     : VMEM scratch (T, B, H) for per-step layer-2 hidden states
    """
    T, B, fourH = gx1_ref.shape
    H = fourH // 4
    V = wlin_ref.shape[1]

    # Hoist loop-invariant reads / broadcasts out of the serial loop.
    whh1 = whh1_ref[...]
    w2 = w2_ref[...]
    b2 = jnp.broadcast_to(b2_ref[...], (B, fourH))

    # NOTE: at realistic sizes, cast matmul operands to bf16 (keep f32 accumulation)
    # for v6e/v7x MXU throughput; kept f32 here to match PyTorch f32 semantics.
    def cell(gates, c_prev):
        # PyTorch gate order along 4H: i, f, g, o.
        # (Gate slices are 32-lane sub-vreg at H=32; pad H to 128-lane multiples
        #  if H is scaled up to avoid cross-lane relayouts.)
        i_g = jax.nn.sigmoid(gates[:, 0 * H:1 * H])
        f_g = jax.nn.sigmoid(gates[:, 1 * H:2 * H])
        g_g = jnp.tanh(gates[:, 2 * H:3 * H])
        o_g = jax.nn.sigmoid(gates[:, 3 * H:4 * H])
        c_new = f_g * c_prev + i_g * g_g
        h_new = o_g * jnp.tanh(c_new)
        return h_new, c_new

    def step(t, carry):
        h1, c1, h2, c2 = carry
        # Layer 1: only the recurrent matmul remains on the critical path.
        g1 = gx1_ref[t] + jnp.dot(h1, whh1, preferred_element_type=jnp.float32)
        h1n, c1n = cell(g1, c1)
        # Layer 2: single fused matmul for input + recurrent contributions.
        xh = jnp.concatenate([h1n, h2], axis=-1)                 # (B, 2H)
        g2 = jnp.dot(xh, w2, preferred_element_type=jnp.float32) + b2
        h2n, c2n = cell(g2, c2)
        h_all[t] = h2n
        return (h1n, c1n, h2n, c2n)

    z = jnp.zeros((B, H), jnp.float32)
    lax.fori_loop(0, T, step, (z, z, z, z), unroll=True)

    # pad_packed_sequence zero-fills positions t >= cap_len[b]; the linear layer
    # applied to those zeros yields just the bias, matching PyTorch.
    t_ids = lax.broadcasted_iota(jnp.int32, (T, B, 1), 0)
    mask = t_ids < caplen_ref[...][None, :, :]                   # (T, B, 1)
    hs = jnp.where(mask, h_all[...], 0.0).reshape(T * B, H)
    logits = (jnp.dot(hs, wlin_ref[...], preferred_element_type=jnp.float32)
              + blin_ref[...])                                   # (T*B, V)
    out_ref[...] = logits.reshape(T, B, V).astype(out_ref.dtype)


def caption_rnn_forward(features, captions, cap_lens, params, *, max_len):
    """Pallas implementation of CAPTION_RNN.forward.

    features : (B, E) f32
    captions : (B, L) int32
    cap_lens : (B,)   int32 (max_len = int(max(cap_lens)))
    returns  : (outputs (B, T_out, V), seq_lengths (B,))
    """
    B, E = features.shape
    H = params["whh1"].shape[0]
    V = params["wlin"].shape[1]
    T_out = int(max_len)

    # ---- glue: embedding lookup + concat (plain JAX / XLA) ----
    emb = params["embed"][captions]                              # (B, L, E)
    x = jnp.concatenate([features[:, None, :], emb], axis=1)     # (B, L+1, E)
    x = x[:, :T_out].astype(jnp.float32)                         # (B, T, E)
    x_tbe = jnp.transpose(x, (1, 0, 2))                          # (T, B, E)

    # Batched non-recurrent layer-1 projection; bias b1 folded in here.
    gx1 = jnp.einsum('tbe,eg->tbg', x_tbe, params["wih1"]) + params["b1"]

    # Fuse layer-2 input & recurrent weights: gates2 = [h1, h2] @ w2cat + b2.
    w2cat = jnp.concatenate([params["wih2"], params["whh2"]], axis=0)   # (2H, 4H)

    caplen_col = cap_lens.reshape(B, 1).astype(jnp.int32)

    vmem_specs = [pl.BlockSpec(memory_space=pltpu.MemorySpace.VMEM) for _ in range(7)]

    out_tbv = pl.pallas_call(
        _caption_lstm_kernel,
        out_shape=jax.ShapeDtypeStruct((T_out, B, V), jnp.float32),
        in_specs=vmem_specs,
        out_specs=pl.BlockSpec(memory_space=pltpu.MemorySpace.VMEM),
        scratch_shapes=[pltpu.VMEM((T_out, B, H), jnp.float32)],
    )(caplen_col, gx1, params["whh1"], w2cat, params["b2"],
      params["wlin"], params["blin"])

    outputs = jnp.transpose(out_tbv, (1, 0, 2))   # (B, T_out, V), batch-first
    seq_lengths = cap_lens.astype(jnp.int32)
    return outputs, seq_lengths


# ----------------------------------------------------------------------------
# Pure-JAX reference (mirrors PyTorch pack/LSTM/pad/linear semantics) for check.
# Note: h/c keep evolving past cap_len (masked before the projection), which
# matches the returned logits of the PyTorch module; only h/c themselves would
# differ if they were ever returned.
# ----------------------------------------------------------------------------
def _reference(features, captions, cap_lens, params, *, max_len):
    emb = params["embed"][captions]
    x = jnp.concatenate([features[:, None, :], emb], axis=1)
    B = x.shape[0]
    H = params["whh1"].shape[0]
    T_out = int(max_len)

    def cell(x_in, h, c, w_ih, w_hh, b):
        g = x_in @ w_ih + h @ w_hh + b
        i = jax.nn.sigmoid(g[:, 0 * H:1 * H])
        f = jax.nn.sigmoid(g[:, 1 * H:2 * H])
        gg = jnp.tanh(g[:, 2 * H:3 * H])
        o = jax.nn.sigmoid(g[:, 3 * H:4 * H])
        c = f * c + i * gg
        h = o * jnp.tanh(c)
        return h, c

    h1 = c1 = h2 = c2 = jnp.zeros((B, H), jnp.float32)
    outs = []
    for t in range(T_out):
        h1, c1 = cell(x[:, t], h1, c1, params["wih1"], params["whh1"], params["b1"][0])
        h2, c2 = cell(h1, h2, c2, params["wih2"], params["whh2"], params["b2"][0])
        mask = (cap_lens > t)[:, None]
        hm = jnp.where(mask, h2, 0.0)
        outs.append(hm @ params["wlin"] + params["blin"][0])
    return jnp.stack(outs, axis=1)


# ----------------------------------------------------------------------------
def make_params(key, embed_size, hidden_size, vocab_size):
    ks = jax.random.split(key, 11)
    s = 0.1
    H = hidden_size
    p = {
        "embed": jax.random.normal(ks[0], (vocab_size, embed_size), jnp.float32) * s,
        # LSTM layer 1 (stored pre-transposed: (in, 4H) / (H, 4H))
        "wih1": jax.random.normal(ks[1], (embed_size, 4 * H), jnp.float32) * s,
        "whh1": jax.random.normal(ks[2], (H, 4 * H), jnp.float32) * s,
        "b1": (jax.random.normal(ks[3], (1, 4 * H), jnp.float32) * s
               + jax.random.normal(ks[4], (1, 4 * H), jnp.float32) * s),
        # LSTM layer 2
        "wih2": jax.random.normal(ks[5], (H, 4 * H), jnp.float32) * s,
        "whh2": jax.random.normal(ks[6], (H, 4 * H), jnp.float32) * s,
        "b2": (jax.random.normal(ks[7], (1, 4 * H), jnp.float32) * s
               + jax.random.normal(ks[8], (1, 4 * H), jnp.float32) * s),
        # Linear (stored as (H, V))
        "wlin": jax.random.normal(ks[9], (H, vocab_size), jnp.float32) * s,
        "blin": jax.random.normal(ks[10], (1, vocab_size), jnp.float32) * s,
    }
    return p


if __name__ == "__main__":
    embed_size, hidden_size, vocab_size = 32, 32, 64
    B, L = 2, 8                      # captions length L; LSTM input length = L + 1

    key = jax.random.PRNGKey(0)
    k_feat, k_cap, k_par = jax.random.split(key, 3)

    features = jax.random.normal(k_feat, (B, embed_size), jnp.float32)
    captions = jax.random.randint(k_cap, (B, L), 0, vocab_size, jnp.int32)
    cap_lens_host = np.array([L + 1, 6], dtype=np.int32)   # lengths incl. feature token
    cap_lens = jnp.asarray(cap_lens_host)
    max_len = int(cap_lens_host.max())

    params = make_params(k_par, embed_size, hidden_size, vocab_size)

    outputs, seq_lengths = caption_rnn_forward(
        features, captions, cap_lens, params, max_len=max_len)
    outputs = jax.block_until_ready(outputs)

    ref = _reference(features, captions, cap_lens, params, max_len=max_len)
    np.testing.assert_allclose(np.asarray(outputs), np.asarray(ref),
                               rtol=1e-4, atol=1e-4)
    assert outputs.shape == (B, max_len, vocab_size)
    assert np.array_equal(np.asarray(seq_lengths), cap_lens_host)

    print("KERNEL_OK")
</pallas_src>

<mosaic_0001>
module attributes {stable_mosaic.version = 11 : i64} {
  func.func @_caption_lstm_kernel(%arg0: memref<2x1xi32, #tpu.memory_space<vmem>>, %arg1: memref<9x2x128xf32, #tpu.memory_space<vmem>>, %arg2: memref<32x128xf32, #tpu.memory_space<vmem>>, %arg3: memref<64x128xf32, #tpu.memory_space<vmem>>, %arg4: memref<1x128xf32, #tpu.memory_space<vmem>>, %arg5: memref<32x64xf32, #tpu.memory_space<vmem>>, %arg6: memref<1x64xf32, #tpu.memory_space<vmem>>, %arg7: memref<9x2x64xf32, #tpu.memory_space<vmem>>, %arg8: memref<9x2x32xf32, #tpu.memory_space<vmem>>) attributes {dimension_semantics = [], scalar_prefetch = 0 : i64, scratch_operands = 1 : i64, tpu.core_type = #tpu.core_type<tc>} {
    %c0 = arith.constant 0 : index
    %c0_0 = arith.constant 0 : index
    %0 = vector.load %arg2[%c0, %c0_0] : memref<32x128xf32, #tpu.memory_space<vmem>>, vector<32x128xf32>
    %c0_1 = arith.constant 0 : index
    %c0_2 = arith.constant 0 : index
    %1 = vector.load %arg3[%c0_1, %c0_2] : memref<64x128xf32, #tpu.memory_space<vmem>>, vector<64x128xf32>
    %c0_3 = arith.constant 0 : index
    %c0_4 = arith.constant 0 : index
    %2 = vector.load %arg4[%c0_3, %c0_4] : memref<1x128xf32, #tpu.memory_space<vmem>>, vector<1x128xf32>
    %3 = vector.shape_cast %2 : vector<1x128xf32> to vector<1x128xf32>
    %4 = vector.broadcast %3 : vector<1x128xf32> to vector<2x128xf32>
    %cst = arith.constant 0.000000e+00 : f32
    %5 = vector.broadcast %cst : f32 to vector<2x32xf32>
    %c0_i32 = arith.constant 0 : i32
    %6 = arith.index_cast %c0_i32 : i32 to index
    %c0_5 = arith.constant 0 : index
    %c0_6 = arith.constant 0 : index
    %7 = vector.load %arg1[%6, %c0_5, %c0_6] : memref<9x2x128xf32, #tpu.memory_space<vmem>>, vector<1x2x128xf32>
    %8 = vector.shape_cast %7 : vector<1x2x128xf32> to vector<2x128xf32>
    %cst_7 = arith.constant dense<0.000000e+00> : vector<2x128xf32>
    %9 = tpu.matmul %5, %0, %cst_7 {dimension_numbers = #tpu.dot_dimension_numbers<[1], [0], [0], [1], [0, 0, 1, 1], [], []>} : vector<2x32xf32>, vector<32x128xf32>, vector<2x128xf32> -> vector<2x128xf32>
    %10 = arith.addf %8, %9 : vector<2x128xf32>
    %11 = vector.extract_strided_slice %10 {offsets = [0, 0], sizes = [2, 32], strides = [1, 1]} : vector<2x128xf32> to vector<2x32xf32>
    %12 = arith.negf %11 : vector<2x32xf32>
    %13 = math.exp %12 : vector<2x32xf32>
    %cst_8 = arith.constant 1.000000e+00 : f32
    %14 = vector.broadcast %cst_8 : f32 to vector<2x32xf32>
    %15 = arith.addf %14, %13 : vector<2x32xf32>
    %16 = arith.divf %14, %15 : vector<2x32xf32>
    %17 = vector.extract_strided_slice %10 {offsets = [0, 32], sizes = [2, 32], strides = [1, 1]} : vector<2x128xf32> to vector<2x32xf32>
    %18 = arith.negf %17 : vector<2x32xf32>
    %19 = math.exp %18 : vector<2x32xf32>
    %cst_9 = arith.constant 1.000000e+00 : f32
    %20 = vector.broadcast %cst_9 : f32 to vector<2x32xf32>
    %21 = arith.addf %20, %19 : vector<2x32xf32>
    %22 = arith.divf %20, %21 : vector<2x32xf32>
    %23 = vector.extract_strided_slice %10 {offsets = [0, 64], sizes = [2, 32], strides = [1, 1]} : vector<2x128xf32> to vector<2x32xf32>
    %24 = math.tanh %23 : vector<2x32xf32>
    %25 = vector.extract_strided_slice %10 {offsets = [0, 96], sizes = [2, 32], strides = [1, 1]} : vector<2x128xf32> to vector<2x32xf32>
    %26 = arith.negf %25 : vector<2x32xf32>
    %27 = math.exp %26 : vector<2x32xf32>
    %cst_10 = arith.constant 1.000000e+00 : f32
    %28 = vector.broadcast %cst_10 : f32 to vector<2x32xf32>
    %29 = arith.addf %28, %27 : vector<2x32xf32>
    %30 = arith.divf %28, %29 : vector<2x32xf32>
    %31 = arith.mulf %22, %5 : vector<2x32xf32>
    %32 = arith.mulf %16, %24 : vector<2x32xf32>
    %33 = arith.addf %31, %32 : vector<2x32xf32>
    %34 = math.tanh %33 : vector<2x32xf32>
    %35 = arith.mulf %30, %34 : vector<2x32xf32>
    %36 = tpu.concatenate %35, %5 in 1 : vector<2x32xf32>, vector<2x32xf32> -> vector<2x64xf32>
    %cst_11 = arith.constant dense<0.000000e+00> : vector<2x128xf32>
    %37 = tpu.matmul %36, %1, %cst_11 {dimension_numbers = #tpu.dot_dimension_numbers<[1], [0], [0], [1], [0, 0, 1, 1], [], []>} : vector<2x64xf32>, vector<64x128xf32>, vector<2x128xf32> -> vector<2x128xf32>
    %38 = arith.addf %37, %4 : vector<2x128xf32>
    %39 = vector.extract_strided_slice %38 {offsets = [0, 0], sizes = [2, 32], strides = [1, 1]} : vector<2x128xf32> to vector<2x32xf32>
    %40 = arith.negf %39 : vector<2x32xf32>
    %41 = math.exp %40 : vector<2x32xf32>
    %cst_12 = arith.constant 1.000000e+00 : f32
    %42 = vector.broadcast %cst_12 : f32 to vector<2x32xf32>
    %43 = arith.addf %42, %41 : vector<2x32xf32>
    %44 = arith.divf %42, %43 : vector<2x32xf32>
    %45 = vector.extract_strided_slice %38 {offsets = [0, 32], sizes = [2, 32], strides = [1, 1]} : vector<2x128xf32> to vector<2x32xf32>
    %46 = arith.negf %45 : vector<2x32xf32>
    %47 = math.exp %46 : vector<2x32xf32>
    %cst_13 = arith.constant 1.000000e+00 : f32
    %48 = vector.broadcast %cst_13 : f32 to vector<2x32xf32>
    %49 = arith.addf %48, %47 : vector<2x32xf32>
    %50 = arith.divf %48, %49 : vector<2x32xf32>
    %51 = vector.extract_strided_slice %38 {offsets = [0, 64], sizes = [2, 32], strides = [1, 1]} : vector<2x128xf32> to vector<2x32xf32>
    %52 = math.tanh %51 : vector<2x32xf32>
    %53 = vector.extract_strided_slice %38 {offsets = [0, 96], sizes = [2, 32], strides = [1, 1]} : vector<2x128xf32> to vector<2x32xf32>
    %54 = arith.negf %53 : vector<2x32xf32>
    %55 = math.exp %54 : vector<2x32xf32>
    %cst_14 = arith.constant 1.000000e+00 : f32
    %56 = vector.broadcast %cst_14 : f32 to vector<2x32xf32>
    %57 = arith.addf %56, %55 : vector<2x32xf32>
    %58 = arith.divf %56, %57 : vector<2x32xf32>
    %59 = arith.mulf %50, %5 : vector<2x32xf32>
    %60 = arith.mulf %44, %52 : vector<2x32xf32>
    %61 = arith.addf %59, %60 : vector<2x32xf32>
    %62 = math.tanh %61 : vector<2x32xf32>
    %63 = arith.mulf %58, %62 : vector<2x32xf32>
    %64 = arith.index_cast %c0_i32 : i32 to index
    %c0_15 = arith.constant 0 : index
    %c0_16 = arith.constant 0 : index
    %65 = vector.load %arg8[%64, %c0_15, %c0_16] : memref<9x2x32xf32, #tpu.memory_space<vmem>>, vector<1x2x32xf32>
    %66 = vector.shape_cast %65 : vector<1x2x32xf32> to vector<2x32xf32>
    %67 = vector.shape_cast %63 : vector<2x32xf32> to vector<1x2x32xf32>
    tpu.vector_store %arg8[%64, %c0_15, %c0_16], %67 {strides = array<i32>} : memref<9x2x32xf32, #tpu.memory_space<vmem>>, vector<1x2x32xf32>,
    %c1_i32 = arith.constant 1 : i32
    %68 = arith.index_cast %c1_i32 : i32 to index
    %c0_17 = arith.constant 0 : index
    %c0_18 = arith.constant 0 : index
    %69 = vector.load %arg1[%68, %c0_17, %c0_18] : memref<9x2x128xf32, #tpu.memory_space<vmem>>, vector<1x2x128xf32>
    %70 = vector.shape_cast %69 : vector<1x2x128xf32> to vector<2x128xf32>
    %cst_19 = arith.constant dense<0.000000e+00> : vector<2x128xf32>
    %71 = tpu.matmul %35, %0, %cst_19 {dimension_numbers = #tpu.dot_dimension_numbers<[1], [0], [0], [1], [0, 0, 1, 1], [], []>} : vector<2x32xf32>, vector<32x128xf32>, vector<2x128xf32> -> vector<2x128xf32>
    %72 = arith.addf %70, %71 : vector<2x128xf32>
    %73 = vector.extract_strided_slice %72 {offsets = [0, 0], sizes = [2, 32], strides = [1, 1]} : vector<2x128xf32> to vector<2x32xf32>
    %74 = arith.negf %73 : vector<2x32xf32>
    %75 = math.exp %74 : vector<2x32xf32>
    %cst_20 = arith.constant 1.000000e+00 : f32
    %76 = vector.broadcast %cst_20 : f32 to vector<2x32xf32>
    %77 = arith.addf %76, %75 : vector<2x32xf32>
    %78 = arith.divf %76, %77 : vector<2x32xf32>
    %79 = vector.extract_strided_slice %72 {offsets = [0, 32], sizes = [2, 32], strides = [1, 1]} : vector<2x128xf32> to vector<2x32xf32>
    %80 = arith.negf %79 : vector<2x32xf32>
    %81 = math.exp %80 : vector<2x32xf32>
    %cst_21 = arith.constant 1.000000e+00 : f32
    %82 = vector.broadcast %cst_21 : f32 to vector<2x32xf32>
    %83 = arith.addf %82, %81 : vector<2x32xf32>
    %84 = arith.divf %82, %83 : vector<2x32xf32>
    %85 = vector.extract_strided_slice %72 {offsets = [0, 64], sizes = [2, 32], strides = [1, 1]} : vector<2x128xf32> to vector<2x32xf32>
    %86 = math.tanh %85 : vector<2x32xf32>
    %87 = vector.extract_strided_slice %72 {offsets = [0, 96], sizes = [2, 32], strides = [1, 1]} : vector<2x128xf32> to vector<2x32xf32>
    %88 = arith.negf %87 : vector<2x32xf32>
    %89 = math.exp %88 : vector<2x32xf32>
    %cst_22 = arith.constant 1.000000e+00 : f32
    %90 = vector.broadcast %cst_22 : f32 to vector<2x32xf32>
    %91 = arith.addf %90, %89 : vector<2x32xf32>
    %92 = arith.divf %90, %91 : vector<2x32xf32>
    %93 = arith.mulf %84, %33 : vector<2x32xf32>
    %94 = arith.mulf %78, %86 : vector<2x32xf32>
    %95 = arith.addf %93, %94 : vector<2x32xf32>
    %96 = math.tanh %95 : vector<2x32xf32>
    %97 = arith.mulf %92, %96 : vector<2x32xf32>
    %98 = tpu.concatenate %97, %63 in 1 : vector<2x32xf32>, vector<2x32xf32> -> vector<2x64xf32>
    %cst_23 = arith.constant dense<0.000000e+00> : vector<2x128xf32>
    %99 = tpu.matmul %98, %1, %cst_23 {dimension_numbers = #tpu.dot_dimension_numbers<[1], [0], [0], [1], [0, 0, 1, 1], [], []>} : vector<2x64xf32>, vector<64x128xf32>, vector<2x128xf32> -> vector<2x128xf32>
    %100 = arith.addf %99, %4 : vector<2x128xf32>
    %101 = vector.extract_strided_slice %100 {offsets = [0, 0], sizes = [2, 32], strides = [1, 1]} : vector<2x128xf32> to vector<2x32xf32>
    %102 = arith.negf %101 : vector<2x32xf32>
    %103 = math.exp %102 : vector<2x32xf32>
    %cst_24 = arith.constant 1.000000e+00 : f32
    %104 = vector.broadcast %cst_24 : f32 to vector<2x32xf32>
    %105 = arith.addf %104, %103 : vector<2x32xf32>
    %106 = arith.divf %104, %105 : vector<2x32xf32>
    %107 = vector.extract_strided_slice %100 {offsets = [0, 32], sizes = [2, 32], strides = [1, 1]} : vector<2x128xf32> to vector<2x32xf32>
    %108 = arith.negf %107 : vector<2x32xf32>
    %109 = math.exp %108 : vector<2x32xf32>
    %cst_25 = arith.constant 1.000000e+00 : f32
    %110 = vector.broadcast %cst_25 : f32 to vector<2x32xf32>
    %111 = arith.addf %110, %109 : vector<2x32xf32>
    %112 = arith.divf %110, %111 : vector<2x32xf32>
    %113 = vector.extract_strided_slice %100 {offsets = [0, 64], sizes = [2, 32], strides = [1, 1]} : vector<2x128xf32> to vector<2x32xf32>
    %114 = math.tanh %113 : vector<2x32xf32>
    %115 = vector.extract_strided_slice %100 {offsets = [0, 96], sizes = [2, 32], strides = [1, 1]} : vector<2x128xf32> to vector<2x32xf32>
    %116 = arith.negf %115 : vector<2x32xf32>
    %117 = math.exp %116 : vector<2x32xf32>
    %cst_26 = arith.constant 1.000000e+00 : f32
    %118 = vector.broadcast %cst_26 : f32 to vector<2x32xf32>
    %119 = arith.addf %118, %117 : vector<2x32xf32>
    %120 = arith.divf %118, %119 : vector<2x32xf32>
    %121 = arith.mulf %112, %61 : vector<2x32xf32>
    %122 = arith.mulf %106, %114 : vector<2x32xf32>
    %123 = arith.addf %121, %122 : vector<2x32xf32>
    %124 = math.tanh %123 : vector<2x32xf32>
    %125 = arith.mulf %120, %124 : vector<2x32xf32>
    %126 = arith.index_cast %c1_i32 : i32 to index
    %c0_27 = arith.constant 0 : index
    %c0_28 = arith.constant 0 : index
    %127 = vector.load %arg8[%126, %c0_27, %c0_28] : memref<9x2x32xf32, #tpu.memory_space<vmem>>, vector<1x2x32xf32>
    %128 = vector.shape_cast %127 : vector<1x2x32xf32> to vector<2x32xf32>
    %129 = vector.shape_cast %125 : vector<2x32xf32> to vector<1x2x32xf32>
    tpu.vector_store %arg8[%126, %c0_27, %c0_28], %129 {strides = array<i32>} : memref<9x2x32xf32, #tpu.memory_space<vmem>>, vector<1x2x32xf32>,
    %c2_i32 = arith.constant 2 : i32
    %130 = arith.index_cast %c2_i32 : i32 to index
    %c0_29 = arith.constant 0 : index
    %c0_30 = arith.constant 0 : index
    %131 = vector.load %arg1[%130, %c0_29, %c0_30] : memref<9x2x128xf32, #tpu.memory_space<vmem>>, vector<1x2x128xf32>
    %132 = vector.shape_cast %131 : vector<1x2x128xf32> to vector<2x128xf32>
    %cst_31 = arith.constant dense<0.000000e+00> : vector<2x128xf32>
    %133 = tpu.matmul %97, %0, %cst_31 {dimension_numbers = #tpu.dot_dimension_numbers<[1], [0], [0], [1], [0, 0, 1, 1], [], []>} : vector<2x32xf32>, vector<32x128xf32>, vector<2x128xf32> -> vector<2x128xf32>
    %134 = arith.addf %132, %133 : vector<2x128xf32>
    %135 = vector.extract_strided_slice %134 {offsets = [0, 0], sizes = [2, 32], strides = [1, 1]} : vector<2x128xf32> to vector<2x32xf32>
    %136 = arith.negf %135 : vector<2x32xf32>
    %137 = math.exp %136 : vector<2x32xf32>
    %cst_32 = arith.constant 1.000000e+00 : f32
    %138 = vector.broadcast %cst_32 : f32 to vector<2x32xf32>
    %139 = arith.addf %138, %137 : vector<2x32xf32>
    %140 = arith.divf %138, %139 : vector<2x32xf32>
    %141 = vector.extract_strided_slice %134 {offsets = [0, 32], sizes = [2, 32], strides = [1, 1]} : vector<2x128xf32> to vector<2x32xf32>
    %142 = arith.negf %141 : vector<2x32xf32>
    %143 = math.exp %142 : vector<2x32xf32>
    %cst_33 = arith.constant 1.000000e+00 : f32
    %144 = vector.broadcast %cst_33 : f32 to vector<2x32xf32>
    %145 = arith.addf %144, %143 : vector<2x32xf32>
    %146 = arith.divf %144, %145 : vector<2x32xf32>
    %147 = vector.extract_strided_slice %134 {offsets = [0, 64], sizes = [2, 32], strides = [1, 1]} : vector<2x128xf32> to vector<2x32xf32>
    %148 = math.tanh %147 : vector<2x32xf32>
    %149 = vector.extract_strided_slice %134 {offsets = [0, 96], sizes = [2, 32], strides = [1, 1]} : vector<2x128xf32> to vector<2x32xf32>
    %150 = arith.negf %149 : vector<2x32xf32>
    %151 = math.exp %150 : vector<2x32xf32>
    %cst_34 = arith.constant 1.000000e+00 : f32
    %152 = vector.broadcast %cst_34 : f32 to vector<2x32xf32>
    %153 = arith.addf %152, %151 : vector<2x32xf32>
    %154 = arith.divf %152, %153 : vector<2x32xf32>
    %155 = arith.mulf %146, %95 : vector<2x32xf32>
    %156 = arith.mulf %140, %148 : vector<2x32xf32>
    %157 = arith.addf %155, %156 : vector<2x32xf32>
    %158 = math.tanh %157 : vector<2x32xf32>
    %159 = arith.mulf %154, %158 : vector<2x32xf32>
    %160 = tpu.concatenate %159, %125 in 1 : vector<2x32xf32>, vector<2x32xf32> -> vector<2x64xf32>
    %cst_35 = arith.constant dense<0.000000e+00> : vector<2x128xf32>
    %161 = tpu.matmul %160, %1, %cst_35 {dimension_numbers = #tpu.dot_dimension_numbers<[1], [0], [0], [1], [0, 0, 1, 1], [], []>} : vector<2x64xf32>, vector<64x128xf32>, vector<2x128xf32> -> vector<2x128xf32>
    %162 = arith.addf %161, %4 : vector<2x128xf32>
    %163 = vector.extract_strided_slice %162 {offsets = [0, 0], sizes = [2, 32], strides = [1, 1]} : vector<2x128xf32> to vector<2x32xf32>
    %164 = arith.negf %163 : vector<2x32xf32>
    %165 = math.exp %164 : vector<2x32xf32>
    %cst_36 = arith.constant 1.000000e+00 : f32
    %166 = vector.broadcast %cst_36 : f32 to vector<2x32xf32>
    %167 = arith.addf %166, %165 : vector<2x32xf32>
    %168 = arith.divf %166, %167 : vector<2x32xf32>
    %169 = vector.extract_strided_slice %162 {offsets = [0, 32], sizes = [2, 32], strides = [1, 1]} : vector<2x128xf32> to vector<2x32xf32>
    %170 = arith.negf %169 : vector<2x32xf32>
    %171 = math.exp %170 : vector<2x32xf32>
    %cst_37 = arith.constant 1.000000e+00 : f32
    %172 = vector.broadcast %cst_37 : f32 to vector<2x32xf32>
    %173 = arith.addf %172, %171 : vector<2x32xf32>
    %174 = arith.divf %172, %173 : vector<2x32xf32>
    %175 = vector.extract_strided_slice %162 {offsets = [0, 64], sizes = [2, 32], strides = [1, 1]} : vector<2x128xf32> to vector<2x32xf32>
    %176 = math.tanh %175 : vector<2x32xf32>
    %177 = vector.extract_strided_slice %162 {offsets = [0, 96], sizes = [2, 32], strides = [1, 1]} : vector<2x128xf32> to vector<2x32xf32>
    %178 = arith.negf %177 : vector<2x32xf32>
    %179 = math.exp %178 : vector<2x32xf32>
    %cst_38 = arith.constant 1.000000e+00 : f32
    %180 = vector.broadcast %cst_38 : f32 to vector<2x32xf32>
    %181 = arith.addf %180, %179 : vector<2x32xf32>
    %182 = arith.divf %180, %181 : vector<2x32xf32>
    %183 = arith.mulf %174, %123 : vector<2x32xf32>
    %184 = arith.mulf %168, %176 : vector<2x32xf32>
    %185 = arith.addf %183, %184 : vector<2x32xf32>
    %186 = math.tanh %185 : vector<2x32xf32>
    %187 = arith.mulf %182, %186 : vector<2x32xf32>
    %188 = arith.index_cast %c2_i32 : i32 to index
    %c0_39 = arith.constant 0 : index
    %c0_40 = arith.constant 0 : index
    %189 = vector.load %arg8[%188, %c0_39, %c0_40] : memref<9x2x32xf32, #tpu.memory_space<vmem>>, vector<1x2x32xf32>
    %190 = vector.shape_cast %189 : vector<1x2x32xf32> to vector<2x32xf32>
    %191 = vector.shape_cast %187 : vector<2x32xf32> to vector<1x2x32xf32>
    tpu.vector_store %arg8[%188, %c0_39, %c0_40], %191 {strides = array<i32>} : memref<9x2x32xf32, #tpu.memory_space<vmem>>, vector<1x2x32xf32>,
    %c3_i32 = arith.constant 3 : i32
    %192 = arith.index_cast %c3_i32 : i32 to index
    %c0_41 = arith.constant 0 : index
    %c0_42 = arith.constant 0 : index
    %193 = vector.load %arg1[%192, %c0_41, %c0_42] : memref<9x2x128xf32, #tpu.memory_space<vmem>>, vector<1x2x128xf32>
    %194 = vector.shape_cast %193 : vector<1x2x128xf32> to vector<2x128xf32>
    %cst_43 = arith.constant dense<0.000000e+00> : vector<2x128xf32>
    %195 = tpu.matmul %159, %0, %cst_43 {dimension_numbers = #tpu.dot_dimension_numbers<[1], [0], [0], [1], [0, 0, 1, 1], [], []>} : vector<2x32xf32>, vector<32x128xf32>, vector<2x128xf32> -> vector<2x128xf32>
    %196 = arith.addf %194, %195 : vector<2x128xf32>
    %197 = vector.extract_strided_slice %196 {offsets = [0, 0], sizes = [2, 32], strides = [1, 1]} : vector<2x128xf32> to vector<2x32xf32>
    %198 = arith.negf %197 : vector<2x32xf32>
    %199 = math.exp %198 : vector<2x32xf32>
    %cst_44 = arith.constant 1.000000e+00 : f32
    %200 = vector.broadcast %cst_44 : f32 to vector<2x32xf32>
    %201 = arith.addf %200, %199 : vector<2x32xf32>
    %202 = arith.divf %200, %201 : vector<2x32xf32>
    %203 = vector.extract_strided_slice %196 {offsets = [0, 32], sizes = [2, 32], strides = [1, 1]} : vector<2x128xf32> to vector<2x32xf32>
    %204 = arith.negf %203 : vector<2x32xf32>
    %205 = math.exp %204 : vector<2x32xf32>
    %cst_45 = arith.constant 1.000000e+00 : f32
    %206 = vector.broadcast %cst_45 : f32 to vector<2x32xf32>
    %207 = arith.addf %206, %205 : vector<2x32xf32>
    %208 = arith.divf %206, %207 : vector<2x32xf32>
    %209 = vector.extract_strided_slice %196 {offsets = [0, 64], sizes = [2, 32], strides = [1, 1]} : vector<2x128xf32> to vector<2x32xf32>
    %210 = math.tanh %209 : vector<2x32xf32>
    %211 = vector.extract_strided_slice %196 {offsets = [0, 96], sizes = [2, 32], strides = [1, 1]} : vector<2x128xf32> to vector<2x32xf32>
    %212 = arith.negf %211 : vector<2x32xf32>
    %213 = math.exp %212 : vector<2x32xf32>
    %cst_46 = arith.constant 1.000000e+00 : f32
    %214 = vector.broadcast %cst_46 : f32 to vector<2x32xf32>
    %215 = arith.addf %214, %213 : vector<2x32xf32>
    %216 = arith.divf %214, %215 : vector<2x32xf32>
    %217 = arith.mulf %208, %157 : vector<2x32xf32>
    %218 = arith.mulf %202, %210 : vector<2x32xf32>
    %219 = arith.addf %217, %218 : vector<2x32xf32>
    %220 = math.tanh %219 : vector<2x32xf32>
    %221 = arith.mulf %216, %220 : vector<2x32xf32>
    %222 = tpu.concatenate %221, %187 in 1 : vector<2x32xf32>, vector<2x32xf32> -> vector<2x64xf32>
    %cst_47 = arith.constant dense<0.000000e+00> : vector<2x128xf32>
    %223 = tpu.matmul %222, %1, %cst_47 {dimension_numbers = #tpu.dot_dimension_numbers<[1], [0], [0], [1], [0, 0, 1, 1], [], []>} : vector<2x64xf32>, vector<64x128xf32>, vector<2x128xf32> -> vector<2x128xf32>
    %224 = arith.addf %223, %4 : vector<2x128xf32>
    %225 = vector.extract_strided_slice %224 {offsets = [0, 0], sizes = [2, 32], strides = [1, 1]} : vector<2x128xf32> to vector<2x32xf32>
    %226 = arith.negf %225 : vector<2x32xf32>
    %227 = math.exp %226 : vector<2x32xf32>
    %cst_48 = arith.constant 1.000000e+00 : f32
    %228 = vector.broadcast %cst_48 : f32 to vector<2x32xf32>
    %229 = arith.addf %228, %227 : vector<2x32xf32>
    %230 = arith.divf %228, %229 : vector<2x32xf32>
    %231 = vector.extract_strided_slice %224 {offsets = [0, 32], sizes = [2, 32], strides = [1, 1]} : vector<2x128xf32> to vector<2x32xf32>
    %232 = arith.negf %231 : vector<2x32xf32>
    %233 = math.exp %232 : vector<2x32xf32>
    %cst_49 = arith.constant 1.000000e+00 : f32
    %234 = vector.broadcast %cst_49 : f32 to vector<2x32xf32>
    %235 = arith.addf %234, %233 : vector<2x32xf32>
    %236 = arith.divf %234, %235 : vector<2x32xf32>
    %237 = vector.extract_strided_slice %224 {offsets = [0, 64], sizes = [2, 32], strides = [1, 1]} : vector<2x128xf32> to vector<2x32xf32>
    %238 = math.tanh %237 : vector<2x32xf32>
    %239 = vector.extract_strided_slice %224 {offsets = [0, 96], sizes = [2, 32], strides = [1, 1]} : vector<2x128xf32> to vector<2x32xf32>
    %240 = arith.negf %239 : vector<2x32xf32>
    %241 = math.exp %240 : vector<2x32xf32>
    %cst_50 = arith.constant 1.000000e+00 : f32
    %242 = vector.broadcast %cst_50 : f32 to vector<2x32xf32>
    %243 = arith.addf %242, %241 : vector<2x32xf32>
    %244 = arith.divf %242, %243 : vector<2x32xf32>
    %245 = arith.mulf %236, %185 : vector<2x32xf32>
    %246 = arith.mulf %230, %238 : vector<2x32xf32>
    %247 = arith.addf %245, %246 : vector<2x32xf32>
    %248 = math.tanh %247 : vector<2x32xf32>
    %249 = arith.mulf %244, %248 : vector<2x32xf32>
    %250 = arith.index_cast %c3_i32 : i32 to index
    %c0_51 = arith.constant 0 : index
    %c0_52 = arith.constant 0 : index
    %251 = vector.load %arg8[%250, %c0_51, %c0_52] : memref<9x2x32xf32, #tpu.memory_space<vmem>>, vector<1x2x32xf32>
    %252 = vector.shape_cast %251 : vector<1x2x32xf32> to vector<2x32xf32>
    %253 = vector.shape_cast %249 : vector<2x32xf32> to vector<1x2x32xf32>
    tpu.vector_store %arg8[%250, %c0_51, %c0_52], %253 {strides = array<i32>} : memref<9x2x32xf32, #tpu.memory_space<vmem>>, vector<1x2x32xf32>,
    %c4_i32 = arith.constant 4 : i32
    %254 = arith.index_cast %c4_i32 : i32 to index
    %c0_53 = arith.constant 0 : index
    %c0_54 = arith.constant 0 : index
    %255 = vector.load %arg1[%254, %c0_53, %c0_54] : memref<9x2x128xf32, #tpu.memory_space<vmem>>, vector<1x2x128xf32>
    %256 = vector.shape_cast %255 : vector<1x2x128xf32> to vector<2x128xf32>
    %cst_55 = arith.constant dense<0.000000e+00> : vector<2x128xf32>
    %257 = tpu.matmul %221, %0, %cst_55 {dimension_numbers = #tpu.dot_dimension_numbers<[1], [0], [0], [1], [0, 0, 1, 1], [], []>} : vector<2x32xf32>, vector<32x128xf32>, vector<2x128xf32> -> vector<2x128xf32>
    %258 = arith.addf %256, %257 : vector<2x128xf32>
    %259 = vector.extract_strided_slice %258 {offsets = [0, 0], sizes = [2, 32], strides = [1, 1]} : vector<2x128xf32> to vector<2x32xf32>
    %260 = arith.negf %259 : vector<2x32xf32>
    %261 = math.exp %260 : vector<2x32xf32>
    %cst_56 = arith.constant 1.000000e+00 : f32
    %262 = vector.broadcast %cst_56 : f32 to vector<2x32xf32>
    %263 = arith.addf %262, %261 : vector<2x32xf32>
    %264 = arith.divf %262, %263 : vector<2x32xf32>
    %265 = vector.extract_strided_slice %258 {offsets = [0, 32], sizes = [2, 32], strides = [1, 1]} : vector<2x128xf32> to vector<2x32xf32>
    %266 = arith.negf %265 : vector<2x32xf32>
    %267 = math.exp %266 : vector<2x32xf32>
    %cst_57 = arith.constant 1.000000e+00 : f32
    %268 = vector.broadcast %cst_57 : f32 to vector<2x32xf32>
    %269 = arith.addf %268, %267 : vector<2x32xf32>
    %270 = arith.divf %268, %269 : vector<2x32xf32>
    %271 = vector.extract_strided_slice %258 {offsets = [0, 64], sizes = [2, 32], strides = [1, 1]} : vector<2x128xf32> to vector<2x32xf32>
    %272 = math.tanh %271 : vector<2x32xf32>
    %273 = vector.extract_strided_slice %258 {offsets = [0, 96], sizes = [2, 32], strides = [1, 1]} : vector<2x128xf32> to vector<2x32xf32>
    %274 = arith.negf %273 : vector<2x32xf32>
    %275 = math.exp %274 : vector<2x32xf32>
    %cst_58 = arith.constant 1.000000e+00 : f32
    %276 = vector.broadcast %cst_58 : f32 to vector<2x32xf32>
    %277 = arith.addf %276, %275 : vector<2x32xf32>
    %278 = arith.divf %276, %277 : vector<2x32xf32>
    %279 = arith.mulf %270, %219 : vector<2x32xf32>
    %280 = arith.mulf %264, %272 : vector<2x32xf32>
    %281 = arith.addf %279, %280 : vector<2x32xf32>
    %282 = math.tanh %281 : vector<2x32xf32>
    %283 = arith.mulf %278, %282 : vector<2x32xf32>
    %284 = tpu.concatenate %283, %249 in 1 : vector<2x32xf32>, vector<2x32xf32> -> vector<2x64xf32>
    %cst_59 = arith.constant dense<0.000000e+00> : vector<2x128xf32>
    %285 = tpu.matmul %284, %1, %cst_59 {dimension_numbers = #tpu.dot_dimension_numbers<[1], [0], [0], [1], [0, 0, 1, 1], [], []>} : vector<2x64xf32>, vector<64x128xf32>, vector<2x128xf32> -> vector<2x128xf32>
    %286 = arith.addf %285, %4 : vector<2x128xf32>
    %287 = vector.extract_strided_slice %286 {offsets = [0, 0], sizes = [2, 32], strides = [1, 1]} : vector<2x128xf32> to vector<2x32xf32>
    %288 = arith.negf %287 : vector<2x32xf32>
    %289 = math.exp %288 : vector<2x32xf32>
    %cst_60 = arith.constant 1.000000e+00 : f32
    %290 = vector.broadcast %cst_60 : f32 to vector<2x32xf32>
    %291 = arith.addf %290, %289 : vector<2x32xf32>
    %292 = arith.divf %290, %291 : vector<2x32xf32>
    %293 = vector.extract_strided_slice %286 {offsets = [0, 32], sizes = [2, 32], strides = [1, 1]} : vector<2x128xf32> to vector<2x32xf32>
    %294 = arith.negf %293 : vector<2x32xf32>
    %295 = math.exp %294 : vector<2x32xf32>
    %cst_61 = arith.constant 1.000000e+00 : f32
    %296 = vector.broadcast %cst_61 : f32 to vector<2x32xf32>
    %297 = arith.addf %296, %295 : vector<2x32xf32>
    %298 = arith.divf %296, %297 : vector<2x32xf32>
    %299 = vector.extract_strided_slice %286 {offsets = [0, 64], sizes = [2, 32], strides = [1, 1]} : vector<2x128xf32> to vector<2x32xf32>
    %300 = math.tanh %299 : vector<2x32xf32>
    %301 = vector.extract_strided_slice %286 {offsets = [0, 96], sizes = [2, 32], strides = [1, 1]} : vector<2x128xf32> to vector<2x32xf32>
    %302 = arith.negf %301 : vector<2x32xf32>
    %303 = math.exp %302 : vector<2x32xf32>
    %cst_62 = arith.constant 1.000000e+00 : f32
    %304 = vector.broadcast %cst_62 : f32 to vector<2x32xf32>
    %305 = arith.addf %304, %303 : vector<2x32xf32>
    %306 = arith.divf %304, %305 : vector<2x32xf32>
    %307 = arith.mulf %298, %247 : vector<2x32xf32>
    %308 = arith.mulf %292, %300 : vector<2x32xf32>
    %309 = arith.addf %307, %308 : vector<2x32xf32>
    %310 = math.tanh %309 : vector<2x32xf32>
    %311 = arith.mulf %306, %310 : vector<2x32xf32>
    %312 = arith.index_cast %c4_i32 : i32 to index
    %c0_63 = arith.constant 0 : index
    %c0_64 = arith.constant 0 : index
    %313 = vector.load %arg8[%312, %c0_63, %c0_64] : memref<9x2x32xf32, #tpu.memory_space<vmem>>, vector<1x2x32xf32>
    %314 = vector.shape_cast %313 : vector<1x2x32xf32> to vector<2x32xf32>
    %315 = vector.shape_cast %311 : vector<2x32xf32> to vector<1x2x32xf32>
    tpu.vector_store %arg8[%312, %c0_63, %c0_64], %315 {strides = array<i32>} : memref<9x2x32xf32, #tpu.memory_space<vmem>>, vector<1x2x32xf32>,
    %c5_i32 = arith.constant 5 : i32
    %316 = arith.index_cast %c5_i32 : i32 to index
    %c0_65 = arith.constant 0 : index
    %c0_66 = arith.constant 0 : index
    %317 = vector.load %arg1[%316, %c0_65, %c0_66] : memref<9x2x128xf32, #tpu.memory_space<vmem>>, vector<1x2x128xf32>
    %318 = vector.shape_cast %317 : vector<1x2x128xf32> to vector<2x128xf32>
    %cst_67 = arith.constant dense<0.000000e+00> : vector<2x128xf32>
    %319 = tpu.matmul %283, %0, %cst_67 {dimension_numbers = #tpu.dot_dimension_numbers<[1], [0], [0], [1], [0, 0, 1, 1], [], []>} : vector<2x32xf32>, vector<32x128xf32>, vector<2x128xf32> -> vector<2x128xf32>
    %320 = arith.addf %318, %319 : vector<2x128xf32>
    %321 = vector.extract_strided_slice %320 {offsets = [0, 0], sizes = [2, 32], strides = [1, 1]} : vector<2x128xf32> to vector<2x32xf32>
    %322 = arith.negf %321 : vector<2x32xf32>
    %323 = math.exp %322 : vector<2x32xf32>
    %cst_68 = arith.constant 1.000000e+00 : f32
    %324 = vector.broadcast %cst_68 : f32 to vector<2x32xf32>
    %325 = arith.addf %324, %323 : vector<2x32xf32>
    %326 = arith.divf %324, %325 : vector<2x32xf32>
    %327 = vector.extract_strided_slice %320 {offsets = [0, 32], sizes = [2, 32], strides = [1, 1]} : vector<2x128xf32> to vector<2x32xf32>
    %328 = arith.negf %327 : vector<2x32xf32>
    %329 = math.exp %328 : vector<2x32xf32>
    %cst_69 = arith.constant 1.000000e+00 : f32
    %330 = vector.broadcast %cst_69 : f32 to vector<2x32xf32>
    %331 = arith.addf %330, %329 : vector<2x32xf32>
    %332 = arith.divf %330, %331 : vector<2x32xf32>
    %333 = vector.extract_strided_slice %320 {offsets = [0, 64], sizes = [2, 32], strides = [1, 1]} : vector<2x128xf32> to vector<2x32xf32>
    %334 = math.tanh %333 : vector<2x32xf32>
    %335 = vector.extract_strided_slice %320 {offsets = [0, 96], sizes = [2, 32], strides = [1, 1]} : vector<2x128xf32> to vector<2x32xf32>
    %336 = arith.negf %335 : vector<2x32xf32>
    %337 = math.exp %336 : vector<2x32xf32>
    %cst_70 = arith.constant 1.000000e+00 : f32
    %338 = vector.broadcast %cst_70 : f32 to vector<2x32xf32>
    %339 = arith.addf %338, %337 : vector<2x32xf32>
    %340 = arith.divf %338, %339 : vector<2x32xf32>
    %341 = arith.mulf %332, %281 : vector<2x32xf32>
    %342 = arith.mulf %326, %334 : vector<2x32xf32>
    %343 = arith.addf %341, %342 : vector<2x32xf32>
    %344 = math.tanh %343 : vector<2x32xf32>
    %345 = arith.mulf %340, %344 : vector<2x32xf32>
    %346 = tpu.concatenate %345, %311 in 1 : vector<2x32xf32>, vector<2x32xf32> -> vector<2x64xf32>
    %cst_71 = arith.constant dense<0.000000e+00> : vector<2x128xf32>
    %347 = tpu.matmul %346, %1, %cst_71 {dimension_numbers = #tpu.dot_dimension_numbers<[1], [0], [0], [1], [0, 0, 1, 1], [], []>} : vector<2x64xf32>, vector<64x128xf32>, vector<2x128xf32> -> vector<2x128xf32>
    %348 = arith.addf %347, %4 : vector<2x128xf32>
    %349 = vector.extract_strided_slice %348 {offsets = [0, 0], sizes = [2, 32], strides = [1, 1]} : vector<2x128xf32> to vector<2x32xf32>
    %350 = arith.negf %349 : vector<2x32xf32>
    %351 = math.exp %350 : vector<2x32xf32>
    %cst_72 = arith.constant 1.000000e+00 : f32
    %352 = vector.broadcast %cst_72 : f32 to vector<2x32xf32>
    %353 = arith.addf %352, %351 : vector<2x32xf32>
    %354 = arith.divf %352, %353 : vector<2x32xf32>
    %355 = vector.extract_strided_slice %348 {offsets = [0, 32], sizes = [2, 32], strides = [1, 1]} : vector<2x128xf32> to vector<2x32xf32>
    %356 = arith.negf %355 : vector<2x32xf32>
    %357 = math.exp %356 : vector<2x32xf32>
    %cst_73 = arith.constant 1.000000e+00 : f32
    %358 = vector.broadcast %cst_73 : f32 to vector<2x32xf32>
    %359 = arith.addf %358, %357 : vector<2x32xf32>
    %360 = arith.divf %358, %359 : vector<2x32xf32>
    %361 = vector.extract_strided_slice %348 {offsets = [0, 64], sizes = [2, 32], strides = [1, 1]} : vector<2x128xf32> to vector<2x32xf32>
    %362 = math.tanh %361 : vector<2x32xf32>
    %363 = vector.extract_strided_slice %348 {offsets = [0, 96], sizes = [2, 32], strides = [1, 1]} : vector<2x128xf32> to vector<2x32xf32>
    %364 = arith.negf %363 : vector<2x32xf32>
    %365 = math.exp %364 : vector<2x32xf32>
    %cst_74 = arith.constant 1.000000e+00 : f32
    %366 = vector.broadcast %cst_74 : f32 to vector<2x32xf32>
    %367 = arith.addf %366, %365 : vector<2x32xf32>
    %368 = arith.divf %366, %367 : vector<2x32xf32>
    %369 = arith.mulf %360, %309 : vector<2x32xf32>
    %370 = arith.mulf %354, %362 : vector<2x32xf32>
    %371 = arith.addf %369, %370 : vector<2x32xf32>
    %372 = math.tanh %371 : vector<2x32xf32>
    %373 = arith.mulf %368, %372 : vector<2x32xf32>
    %374 = arith.index_cast %c5_i32 : i32 to index
    %c0_75 = arith.constant 0 : index
    %c0_76 = arith.constant 0 : index
    %375 = vector.load %arg8[%374, %c0_75, %c0_76] : memref<9x2x32xf32, #tpu.memory_space<vmem>>, vector<1x2x32xf32>
    %376 = vector.shape_cast %375 : vector<1x2x32xf32> to vector<2x32xf32>
    %377 = vector.shape_cast %373 : vector<2x32xf32> to vector<1x2x32xf32>
    tpu.vector_store %arg8[%374, %c0_75, %c0_76], %377 {strides = array<i32>} : memref<9x2x32xf32, #tpu.memory_space<vmem>>, vector<1x2x32xf32>,
    %c6_i32 = arith.constant 6 : i32
    %378 = arith.index_cast %c6_i32 : i32 to index
    %c0_77 = arith.constant 0 : index
    %c0_78 = arith.constant 0 : index
    %379 = vector.load %arg1[%378, %c0_77, %c0_78] : memref<9x2x128xf32, #tpu.memory_space<vmem>>, vector<1x2x128xf32>
    %380 = vector.shape_cast %379 : vector<1x2x128xf32> to vector<2x128xf32>
    %cst_79 = arith.constant dense<0.000000e+00> : vector<2x128xf32>
    %381 = tpu.matmul %345, %0, %cst_79 {dimension_numbers = #tpu.dot_dimension_numbers<[1], [0], [0], [1], [0, 0, 1, 1], [], []>} : vector<2x32xf32>, vector<32x128xf32>, vector<2x128xf32> -> vector<2x128xf32>
    %382 = arith.addf %380, %381 : vector<2x128xf32>
    %383 = vector.extract_strided_slice %382 {offsets = [0, 0], sizes = [2, 32], strides = [1, 1]} : vector<2x128xf32> to vector<2x32xf32>
    %384 = arith.negf %383 : vector<2x32xf32>
    %385 = math.exp %384 : vector<2x32xf32>
    %cst_80 = arith.constant 1.000000e+00 : f32
    %386 = vector.broadcast %cst_80 : f32 to vector<2x32xf32>
    %387 = arith.addf %386, %385 : vector<2x32xf32>
    %388 = arith.divf %386, %387 : vector<2x32xf32>
    %389 = vector.extract_strided_slice %382 {offsets = [0, 32], sizes = [2, 32], strides = [1, 1]} : vector<2x128xf32> to vector<2x32xf32>
    %390 = arith.negf %389 : vector<2x32xf32>
    %391 = math.exp %390 : vector<2x32xf32>
    %cst_81 = arith.constant 1.000000e+00 : f32
    %392 = vector.broadcast %cst_81 : f32 to vector<2x32xf32>
    %393 = arith.addf %392, %391 : vector<2x32xf32>
    %394 = arith.divf %392, %393 : vector<2x32xf32>
    %395 = vector.extract_strided_slice %382 {offsets = [0, 64], sizes = [2, 32], strides = [1, 1]} : vector<2x128xf32> to vector<2x32xf32>
    %396 = math.tanh %395 : vector<2x32xf32>
    %397 = vector.extract_strided_slice %382 {offsets = [0, 96], sizes = [2, 32], strides = [1, 1]} : vector<2x128xf32> to vector<2x32xf32>
    %398 = arith.negf %397 : vector<2x32xf32>
    %399 = math.exp %398 : vector<2x32xf32>
    %cst_82 = arith.constant 1.000000e+00 : f32
    %400 = vector.broadcast %cst_82 : f32 to vector<2x32xf32>
    %401 = arith.addf %400, %399 : vector<2x32xf32>
    %402 = arith.divf %400, %401 : vector<2x32xf32>
    %403 = arith.mulf %394, %343 : vector<2x32xf32>
    %404 = arith.mulf %388, %396 : vector<2x32xf32>
    %405 = arith.addf %403, %404 : vector<2x32xf32>
    %406 = math.tanh %405 : vector<2x32xf32>
    %407 = arith.mulf %402, %406 : vector<2x32xf32>
    %408 = tpu.concatenate %407, %373 in 1 : vector<2x32xf32>, vector<2x32xf32> -> vector<2x64xf32>
    %cst_83 = arith.constant dense<0.000000e+00> : vector<2x128xf32>
    %409 = tpu.matmul %408, %1, %cst_83 {dimension_numbers = #tpu.dot_dimension_numbers<[1], [0], [0], [1], [0, 0, 1, 1], [], []>} : vector<2x64xf32>, vector<64x128xf32>, vector<2x128xf32> -> vector<2x128xf32>
    %410 = arith.addf %409, %4 : vector<2x128xf32>
    %411 = vector.extract_strided_slice %410 {offsets = [0, 0], sizes = [2, 32], strides = [1, 1]} : vector<2x128xf32> to vector<2x32xf32>
    %412 = arith.negf %411 : vector<2x32xf32>
    %413 = math.exp %412 : vector<2x32xf32>
    %cst_84 = arith.constant 1.000000e+00 : f32
    %414 = vector.broadcast %cst_84 : f32 to vector<2x32xf32>
    %415 = arith.addf %414, %413 : vector<2x32xf32>
    %416 = arith.divf %414, %415 : vector<2x32xf32>
    %417 = vector.extract_strided_slice %410 {offsets = [0, 32], sizes = [2, 32], strides = [1, 1]} : vector<2x128xf32> to vector<2x32xf32>
    %418 = arith.negf %417 : vector<2x32xf32>
    %419 = math.exp %418 : vector<2x32xf32>
    %cst_85 = arith.constant 1.000000e+00 : f32
    %420 = vector.broadcast %cst_85 : f32 to vector<2x32xf32>
    %421 = arith.addf %420, %419 : vector<2x32xf32>
    %422 = arith.divf %420, %421 : vector<2x32xf32>
    %423 = vector.extract_strided_slice %410 {offsets = [0, 64], sizes = [2, 32], strides = [1, 1]} : vector<2x128xf32> to vector<2x32xf32>
    %424 = math.tanh %423 : vector<2x32xf32>
    %425 = vector.extract_strided_slice %410 {offsets = [0, 96], sizes = [2, 32], strides = [1, 1]} : vector<2x128xf32> to vector<2x32xf32>
    %426 = arith.negf %425 : vector<2x32xf32>
    %427 = math.exp %426 : vector<2x32xf32>
    %cst_86 = arith.constant 1.000000e+00 : f32
    %428 = vector.broadcast %cst_86 : f32 to vector<2x32xf32>
    %429 = arith.addf %428, %427 : vector<2x32xf32>
    %430 = arith.divf %428, %429 : vector<2x32xf32>
    %431 = arith.mulf %422, %371 : vector<2x32xf32>
    %432 = arith.mulf %416, %424 : vector<2x32xf32>
    %433 = arith.addf %431, %432 : vector<2x32xf32>
    %434 = math.tanh %433 : vector<2x32xf32>
    %435 = arith.mulf %430, %434 : vector<2x32xf32>
    %436 = arith.index_cast %c6_i32 : i32 to index
    %c0_87 = arith.constant 0 : index
    %c0_88 = arith.constant 0 : index
    %437 = vector.load %arg8[%436, %c0_87, %c0_88] : memref<9x2x32xf32, #tpu.memory_space<vmem>>, vector<1x2x32xf32>
    %438 = vector.shape_cast %437 : vector<1x2x32xf32> to vector<2x32xf32>
    %439 = vector.shape_cast %435 : vector<2x32xf32> to vector<1x2x32xf32>
    tpu.vector_store %arg8[%436, %c0_87, %c0_88], %439 {strides = array<i32>} : memref<9x2x32xf32, #tpu.memory_space<vmem>>, vector<1x2x32xf32>,
    %c7_i32 = arith.constant 7 : i32
    %440 = arith.index_cast %c7_i32 : i32 to index
    %c0_89 = arith.constant 0 : index
    %c0_90 = arith.constant 0 : index
    %441 = vector.load %arg1[%440, %c0_89, %c0_90] : memref<9x2x128xf32, #tpu.memory_space<vmem>>, vector<1x2x128xf32>
    %442 = vector.shape_cast %441 : vector<1x2x128xf32> to vector<2x128xf32>
    %cst_91 = arith.constant dense<0.000000e+00> : vector<2x128xf32>
    %443 = tpu.matmul %407, %0, %cst_91 {dimension_numbers = #tpu.dot_dimension_numbers<[1], [0], [0], [1], [0, 0, 1, 1], [], []>} : vector<2x32xf32>, vector<32x128xf32>, vector<2x128xf32> -> vector<2x128xf32>
    %444 = arith.addf %442, %443 : vector<2x128xf32>
    %445 = vector.extract_strided_slice %444 {offsets = [0, 0], sizes = [2, 32], strides = [1, 1]} : vector<2x128xf32> to vector<2x32xf32>
    %446 = arith.negf %445 : vector<2x32xf32>
    %447 = math.exp %446 : vector<2x32xf32>
    %cst_92 = arith.constant 1.000000e+00 : f32
    %448 = vector.broadcast %cst_92 : f32 to vector<2x32xf32>
    %449 = arith.addf %448, %447 : vector<2x32xf32>
    %450 = arith.divf %448, %449 : vector<2x32xf32>
    %451 = vector.extract_strided_slice %444 {offsets = [0, 32], sizes = [2, 32], strides = [1, 1]} : vector<2x128xf32> to vector<2x32xf32>
    %452 = arith.negf %451 : vector<2x32xf32>
    %453 = math.exp %452 : vector<2x32xf32>
    %cst_93 = arith.constant 1.000000e+00 : f32
    %454 = vector.broadcast %cst_93 : f32 to vector<2x32xf32>
    %455 = arith.addf %454, %453 : vector<2x32xf32>
    %456 = arith.divf %454, %455 : vector<2x32xf32>
    %457 = vector.extract_strided_slice %444 {offsets = [0, 64], sizes = [2, 32], strides = [1, 1]} : vector<2x128xf32> to vector<2x32xf32>
    %458 = math.tanh %457 : vector<2x32xf32>
    %459 = vector.extract_strided_slice %444 {offsets = [0, 96], sizes = [2, 32], strides = [1, 1]} : vector<2x128xf32> to vector<2x32xf32>
    %460 = arith.negf %459 : vector<2x32xf32>
    %461 = math.exp %460 : vector<2x32xf32>
    %cst_94 = arith.constant 1.000000e+00 : f32
    %462 = vector.broadcast %cst_94 : f32 to vector<2x32xf32>
    %463 = arith.addf %462, %461 : vector<2x32xf32>
    %464 = arith.divf %462, %463 : vector<2x32xf32>
    %465 = arith.mulf %456, %405 : vector<2x32xf32>
    %466 = arith.mulf %450, %458 : vector<2x32xf32>
    %467 = arith.addf %465, %466 : vector<2x32xf32>
    %468 = math.tanh %467 : vector<2x32xf32>
    %469 = arith.mulf %464, %468 : vector<2x32xf32>
    %470 = tpu.concatenate %469, %435 in 1 : vector<2x32xf32>, vector<2x32xf32> -> vector<2x64xf32>
    %cst_95 = arith.constant dense<0.000000e+00> : vector<2x128xf32>
    %471 = tpu.matmul %470, %1, %cst_95 {dimension_numbers = #tpu.dot_dimension_numbers<[1], [0], [0], [1], [0, 0, 1, 1], [], []>} : vector<2x64xf32>, vector<64x128xf32>, vector<2x128xf32> -> vector<2x128xf32>
    %472 = arith.addf %471, %4 : vector<2x128xf32>
    %473 = vector.extract_strided_slice %472 {offsets = [0, 0], sizes = [2, 32], strides = [1, 1]} : vector<2x128xf32> to vector<2x32xf32>
    %474 = arith.negf %473 : vector<2x32xf32>
    %475 = math.exp %474 : vector<2x32xf32>
    %cst_96 = arith.constant 1.000000e+00 : f32
    %476 = vector.broadcast %cst_96 : f32 to vector<2x32xf32>
    %477 = arith.addf %476, %475 : vector<2x32xf32>
    %478 = arith.divf %476, %477 : vector<2x32xf32>
    %479 = vector.extract_strided_slice %472 {offsets = [0, 32], sizes = [2, 32], strides = [1, 1]} : vector<2x128xf32> to vector<2x32xf32>
    %480 = arith.negf %479 : vector<2x32xf32>
    %481 = math.exp %480 : vector<2x32xf32>
    %cst_97 = arith.constant 1.000000e+00 : f32
    %482 = vector.broadcast %cst_97 : f32 to vector<2x32xf32>
    %483 = arith.addf %482, %481 : vector<2x32xf32>
    %484 = arith.divf %482, %483 : vector<2x32xf32>
    %485 = vector.extract_strided_slice %472 {offsets = [0, 64], sizes = [2, 32], strides = [1, 1]} : vector<2x128xf32> to vector<2x32xf32>
    %486 = math.tanh %485 : vector<2x32xf32>
    %487 = vector.extract_strided_slice %472 {offsets = [0, 96], sizes = [2, 32], strides = [1, 1]} : vector<2x128xf32> to vector<2x32xf32>
    %488 = arith.negf %487 : vector<2x32xf32>
    %489 = math.exp %488 : vector<2x32xf32>
    %cst_98 = arith.constant 1.000000e+00 : f32
    %490 = vector.broadcast %cst_98 : f32 to vector<2x32xf32>
    %491 = arith.addf %490, %489 : vector<2x32xf32>
    %492 = arith.divf %490, %491 : vector<2x32xf32>
    %493 = arith.mulf %484, %433 : vector<2x32xf32>
    %494 = arith.mulf %478, %486 : vector<2x32xf32>
    %495 = arith.addf %493, %494 : vector<2x32xf32>
    %496 = math.tanh %495 : vector<2x32xf32>
    %497 = arith.mulf %492, %496 : vector<2x32xf32>
    %498 = arith.index_cast %c7_i32 : i32 to index
    %c0_99 = arith.constant 0 : index
    %c0_100 = arith.constant 0 : index
    %499 = vector.load %arg8[%498, %c0_99, %c0_100] : memref<9x2x32xf32, #tpu.memory_space<vmem>>, vector<1x2x32xf32>
    %500 = vector.shape_cast %499 : vector<1x2x32xf32> to vector<2x32xf32>
    %501 = vector.shape_cast %497 : vector<2x32xf32> to vector<1x2x32xf32>
    tpu.vector_store %arg8[%498, %c0_99, %c0_100], %501 {strides = array<i32>} : memref<9x2x32xf32, #tpu.memory_space<vmem>>, vector<1x2x32xf32>,
    %c8_i32 = arith.constant 8 : i32
    %502 = arith.index_cast %c8_i32 : i32 to index
    %c0_101 = arith.constant 0 : index
    %c0_102 = arith.constant 0 : index
    %503 = vector.load %arg1[%502, %c0_101, %c0_102] : memref<9x2x128xf32, #tpu.memory_space<vmem>>, vector<1x2x128xf32>
    %504 = vector.shape_cast %503 : vector<1x2x128xf32> to vector<2x128xf32>
    %cst_103 = arith.constant dense<0.000000e+00> : vector<2x128xf32>
    %505 = tpu.matmul %469, %0, %cst_103 {dimension_numbers = #tpu.dot_dimension_numbers<[1], [0], [0], [1], [0, 0, 1, 1], [], []>} : vector<2x32xf32>, vector<32x128xf32>, vector<2x128xf32> -> vector<2x128xf32>
    %506 = arith.addf %504, %505 : vector<2x128xf32>
    %507 = vector.extract_strided_slice %506 {offsets = [0, 0], sizes = [2, 32], strides = [1, 1]} : vector<2x128xf32> to vector<2x32xf32>
    %508 = arith.negf %507 : vector<2x32xf32>
    %509 = math.exp %508 : vector<2x32xf32>
    %cst_104 = arith.constant 1.000000e+00 : f32
    %510 = vector.broadcast %cst_104 : f32 to vector<2x32xf32>
    %511 = arith.addf %510, %509 : vector<2x32xf32>
    %512 = arith.divf %510, %511 : vector<2x32xf32>
    %513 = vector.extract_strided_slice %506 {offsets = [0, 32], sizes = [2, 32], strides = [1, 1]} : vector<2x128xf32> to vector<2x32xf32>
    %514 = arith.negf %513 : vector<2x32xf32>
    %515 = math.exp %514 : vector<2x32xf32>
    %cst_105 = arith.constant 1.000000e+00 : f32
    %516 = vector.broadcast %cst_105 : f32 to vector<2x32xf32>
    %517 = arith.addf %516, %515 : vector<2x32xf32>
    %518 = arith.divf %516, %517 : vector<2x32xf32>
    %519 = vector.extract_strided_slice %506 {offsets = [0, 64], sizes = [2, 32], strides = [1, 1]} : vector<2x128xf32> to vector<2x32xf32>
    %520 = math.tanh %519 : vector<2x32xf32>
    %521 = vector.extract_strided_slice %506 {offsets = [0, 96], sizes = [2, 32], strides = [1, 1]} : vector<2x128xf32> to vector<2x32xf32>
    %522 = arith.negf %521 : vector<2x32xf32>
    %523 = math.exp %522 : vector<2x32xf32>
    %cst_106 = arith.constant 1.000000e+00 : f32
    %524 = vector.broadcast %cst_106 : f32 to vector<2x32xf32>
    %525 = arith.addf %524, %523 : vector<2x32xf32>
    %526 = arith.divf %524, %525 : vector<2x32xf32>
    %527 = arith.mulf %518, %467 : vector<2x32xf32>
    %528 = arith.mulf %512, %520 : vector<2x32xf32>
    %529 = arith.addf %527, %528 : vector<2x32xf32>
    %530 = math.tanh %529 : vector<2x32xf32>
    %531 = arith.mulf %526, %530 : vector<2x32xf32>
    %532 = tpu.concatenate %531, %497 in 1 : vector<2x32xf32>, vector<2x32xf32> -> vector<2x64xf32>
    %cst_107 = arith.constant dense<0.000000e+00> : vector<2x128xf32>
    %533 = tpu.matmul %532, %1, %cst_107 {dimension_numbers = #tpu.dot_dimension_numbers<[1], [0], [0], [1], [0, 0, 1, 1], [], []>} : vector<2x64xf32>, vector<64x128xf32>, vector<2x128xf32> -> vector<2x128xf32>
    %534 = arith.addf %533, %4 : vector<2x128xf32>
    %535 = vector.extract_strided_slice %534 {offsets = [0, 0], sizes = [2, 32], strides = [1, 1]} : vector<2x128xf32> to vector<2x32xf32>
    %536 = arith.negf %535 : vector<2x32xf32>
    %537 = math.exp %536 : vector<2x32xf32>
    %cst_108 = arith.constant 1.000000e+00 : f32
    %538 = vector.broadcast %cst_108 : f32 to vector<2x32xf32>
    %539 = arith.addf %538, %537 : vector<2x32xf32>
    %540 = arith.divf %538, %539 : vector<2x32xf32>
    %541 = vector.extract_strided_slice %534 {offsets = [0, 32], sizes = [2, 32], strides = [1, 1]} : vector<2x128xf32> to vector<2x32xf32>
    %542 = arith.negf %541 : vector<2x32xf32>
    %543 = math.exp %542 : vector<2x32xf32>
    %cst_109 = arith.constant 1.000000e+00 : f32
    %544 = vector.broadcast %cst_109 : f32 to vector<2x32xf32>
    %545 = arith.addf %544, %543 : vector<2x32xf32>
    %546 = arith.divf %544, %545 : vector<2x32xf32>
    %547 = vector.extract_strided_slice %534 {offsets = [0, 64], sizes = [2, 32], strides = [1, 1]} : vector<2x128xf32> to vector<2x32xf32>
    %548 = math.tanh %547 : vector<2x32xf32>
    %549 = vector.extract_strided_slice %534 {offsets = [0, 96], sizes = [2, 32], strides = [1, 1]} : vector<2x128xf32> to vector<2x32xf32>
    %550 = arith.negf %549 : vector<2x32xf32>
    %551 = math.exp %550 : vector<2x32xf32>
    %cst_110 = arith.constant 1.000000e+00 : f32
    %552 = vector.broadcast %cst_110 : f32 to vector<2x32xf32>
    %553 = arith.addf %552, %551 : vector<2x32xf32>
    %554 = arith.divf %552, %553 : vector<2x32xf32>
    %555 = arith.mulf %546, %495 : vector<2x32xf32>
    %556 = arith.mulf %540, %548 : vector<2x32xf32>
    %557 = arith.addf %555, %556 : vector<2x32xf32>
    %558 = math.tanh %557 : vector<2x32xf32>
    %559 = arith.mulf %554, %558 : vector<2x32xf32>
    %560 = arith.index_cast %c8_i32 : i32 to index
    %c0_111 = arith.constant 0 : index
    %c0_112 = arith.constant 0 : index
    %561 = vector.load %arg8[%560, %c0_111, %c0_112] : memref<9x2x32xf32, #tpu.memory_space<vmem>>, vector<1x2x32xf32>
    %562 = vector.shape_cast %561 : vector<1x2x32xf32> to vector<2x32xf32>
    %563 = vector.shape_cast %559 : vector<2x32xf32> to vector<1x2x32xf32>
    tpu.vector_store %arg8[%560, %c0_111, %c0_112], %563 {strides = array<i32>} : memref<9x2x32xf32, #tpu.memory_space<vmem>>, vector<1x2x32xf32>,
    %c9_i32 = arith.constant 9 : i32
    %564 = tpu.iota {dimensions = array<i32: 0>} : vector<9x2x1xi32>
    %c0_113 = arith.constant 0 : index
    %c0_114 = arith.constant 0 : index
    %565 = vector.load %arg0[%c0_113, %c0_114] : memref<2x1xi32, #tpu.memory_space<vmem>>, vector<2x1xi32>
    %566 = vector.shape_cast %565 : vector<2x1xi32> to vector<1x2x1xi32>
    %567 = vector.broadcast %566 : vector<1x2x1xi32> to vector<9x2x1xi32>
    %568 = arith.cmpi slt, %564, %567 : vector<9x2x1xi32>
    %c0_115 = arith.constant 0 : index
    %c0_116 = arith.constant 0 : index
    %c0_117 = arith.constant 0 : index
    %569 = vector.load %arg8[%c0_115, %c0_116, %c0_117] : memref<9x2x32xf32, #tpu.memory_space<vmem>>, vector<9x2x32xf32>
    %cst_118 = arith.constant 0.000000e+00 : f32
    %570 = vector.shape_cast %568 : vector<9x2x1xi1> to vector<9x2x1xi1>
    %571 = vector.broadcast %570 : vector<9x2x1xi1> to vector<9x2x32xi1>
    %572 = vector.broadcast %cst_118 : f32 to vector<9x2x32xf32>
    %573 = arith.select %571, %569, %572 : vector<9x2x32xi1>, vector<9x2x32xf32>
    %574 = vector.shape_cast %573 : vector<9x2x32xf32> to vector<18x32xf32>
    %c0_119 = arith.constant 0 : index
    %c0_120 = arith.constant 0 : index
    %575 = vector.load %arg5[%c0_119, %c0_120] : memref<32x64xf32, #tpu.memory_space<vmem>>, vector<32x64xf32>
    %cst_121 = arith.constant dense<0.000000e+00> : vector<18x64xf32>
    %576 = tpu.matmul %574, %575, %cst_121 {dimension_numbers = #tpu.dot_dimension_numbers<[1], [0], [0], [1], [0, 0, 1, 1], [], []>} : vector<18x32xf32>, vector<32x64xf32>, vector<18x64xf32> -> vector<18x64xf32>
    %c0_122 = arith.constant 0 : index
    %c0_123 = arith.constant 0 : index
    %577 = vector.load %arg6[%c0_122, %c0_123] : memref<1x64xf32, #tpu.memory_space<vmem>>, vector<1x64xf32>
    %578 = vector.broadcast %577 : vector<1x64xf32> to vector<18x64xf32>
    %579 = arith.addf %576, %578 : vector<18x64xf32>
    %580 = vector.shape_cast %579 : vector<18x64xf32> to vector<9x2x64xf32>
    %c0_124 = arith.constant 0 : index
    %c0_125 = arith.constant 0 : index
    %c0_126 = arith.constant 0 : index
    %581 = vector.load %arg7[%c0_124, %c0_125, %c0_126] : memref<9x2x64xf32, #tpu.memory_space<vmem>>, vector<9x2x64xf32>
    tpu.vector_store %arg7[%c0_124, %c0_125, %c0_126], %580 {strides = array<i32>} : memref<9x2x64xf32, #tpu.memory_space<vmem>>, vector<9x2x64xf32>,
    return
  }
}

</mosaic_0001>

<bundles_post_ra>
// kernel: tpu_custom_call.1
= control target key start
LH: loop header
LB: loop body
LE: loop exit
PB: predicated region body
PF: predicated region fallthrough
CT: control target
= control target key end

     0   :  { %12 = vsyncpa [#allocation4], 0  ;;  %s3691_s0 = inlined_call_operand.vmem [shape: s32[2,1], index: 0, kind: input, shape index: {}]   ;;  %s3692_s1 = inlined_call_operand.hbm [shape: f32[9,2,128], index: 1, kind: input, shape index: {}]   ;;  %s3693_s2 = inlined_call_operand.hbm [shape: f32[32,128], index: 2, kind: input, shape index: {}]   ;;  %s3694_s3 = inlined_call_operand.hbm [shape: f32[64,128], index: 3, kind: input, shape index: {}]   ;;  %s3695_s4 = inlined_call_operand.vmem [shape: f32[1,128], index: 4, kind: input, shape index: {}]   ;;  %s3696_s5 = inlined_call_operand.hbm [shape: f32[32,64], index: 5, kind: input, shape index: {}]   ;;  %s3697_s6 = inlined_call_operand.vmem [shape: f32[1,64], index: 6, kind: input, shape index: {}]   ;;  %s3698_s7 = inlined_call_operand.hbm [shape: f32[9,2,64], index: 7, kind: output, shape index: {}]  }
   0x1   :  { %13 = vsyncpa [#allocation7], 0 }
   0x2   :  { %14 = vsyncpa [#allocation10], 0 }
   0x3   :  { %15 = vsyncpa [#allocation5], 0  ;;  %s3033_s24 = smov [#allocation6]  }
   0x4   :  { %s35_s25 = sshll.u32 %s3033_s24, 4  ;;  %s36_s25 = int_to_ptr.vmem [resolvable:$true] %s35_s25 }
   0x5   :  { %s2933_s26 = scalar_lea.vmem %s36_s25, 512  ;;  %p2938_p1 = scmp.lt.s32.totalorder %s36_s25, %s36_s25 }
   0x6   :  { %p2934_p0 = scmp.ne.s32.totalorder %s36_s25, %s2933_s26  ;;  %p2939_p2 = scmp.lt.s32.totalorder %s2933_s26, %s2933_s26 }
   0x8   :  { %p2940_p3 = por %p2939_p2, %p2938_p1 }
   0xa   :  { %p2941_p4 = pnand %p2940_p3, %p2934_p0 }
   0xc   :  { %2944 = shalt.err (!%p2941_p4)
}
   0xd   :  { %s3034_s27 = smov 128   ;;  %s3035_s28 = smov 8  }
   0xe   :  { %41 = dma.hbm_to_vmem [thread:$0]  %s3693_s2, 512, %s36_s25, [#allocation7], %s3034_s27, %s3034_s27, %s3035_s28  }
   0xf   :  { %s3036_s8 = smov [#allocation3]  }
  0x10   :  { %s23_s9 = sshll.u32 %s3036_s8, 4  ;;  %s24_s9 = int_to_ptr.vmem [resolvable:$true] %s23_s9 }
  0x11   :  { %s2953_s10 = scalar_lea.vmem %s24_s9, 288  ;;  %p2958_p6 = scmp.lt.s32.totalorder %s24_s9, %s24_s9 }
  0x12   :  { %p2954_p5 = scmp.ne.s32.totalorder %s24_s9, %s2953_s10  ;;  %p2959_p7 = scmp.lt.s32.totalorder %s2953_s10, %s2953_s10 }
  0x14   :  { %p2960_p8 = por %p2959_p7, %p2958_p6 }
  0x16   :  { %p2961_p9 = pnand %p2960_p8, %p2954_p5 }
  0x18   :  { %2964 = shalt.err (!%p2961_p9)
}
  0x19   :  { %s3037_s11 = smov 32   ;;  %s3038_s12 = smov 2  }
  0x1a   :  { %29 = dma.hbm_to_vmem [thread:$0]  %s3692_s1, 288, %s24_s9, [#allocation4], %s3037_s11, %s3037_s11, %s3038_s12  }
  0x1b   :  { %s3039_s2 = smov [#allocation8]   ;;  %s3040_s16 = smov [#allocation9]  }
  0x1c   :  { %s47_s15 = sshll.u32 %s3039_s2, 4  ;;  %s61_s17 = sshll.u32 %s3040_s16, 4  ;;  %s48_s15 = int_to_ptr.vmem [resolvable:$true] %s47_s15  ;;  %s62_s17 = int_to_ptr.vmem [resolvable:$true] %s61_s17 }
  0x1d   :  { %s2973_s18 = scalar_lea.vmem %s48_s15, 1024  ;;  %p2978_p11 = scmp.lt.s32.totalorder %s48_s15, %s48_s15 }
  0x1e   :  { %p2974_p10 = scmp.ne.s32.totalorder %s48_s15, %s2973_s18  ;;  %p2979_p12 = scmp.lt.s32.totalorder %s2973_s18, %s2973_s18 }
  0x20   :  { %p2980_p13 = por %p2979_p12, %p2978_p11 }
  0x22   :  { %p2981_p0 = pnand %p2980_p13, %p2974_p10 }
  0x24   :  { %2984 = shalt.err (!%p2981_p0)
}
  0x25   :  { %53 = dma.hbm_to_vmem [thread:$0]  %s3694_s3, 1024, %s48_s15, [#allocation7], %s3034_s27, %s3034_s27, %s3035_s28  }
  0x26   :  { %s2993_s1 = scalar_lea.vmem %s62_s17, 512  ;;  %p2998_p2 = scmp.lt.s32.totalorder %s62_s17, %s62_s17 }
  0x27   :  { %p2994_p1 = scmp.ne.s32.totalorder %s62_s17, %s2993_s1  ;;  %p2999_p3 = scmp.lt.s32.totalorder %s2993_s1, %s2993_s1 }
  0x29   :  { %p3000_p4 = por %p2999_p3, %p2998_p2 }
  0x2b   :  { %p3001_p5 = pnand %p3000_p4, %p2994_p1 }
  0x2d   :  { %3004 = shalt.err (!%p3001_p5)
}
  0x2e   :  { %67 = dma.hbm_to_vmem [thread:$0]  %s3696_s5, 512, %s62_s17, [#allocation10], %s3034_s27, %s3034_s27, %s3035_s28  }
  0x2f   :  { %3025 = dma.done.wait [#allocation4], 288  }
  0x30   :  { %3026 = vsyncadd [#allocation4], 4294967008 }
  0x31   :  { %3027 = dma.done.wait [#allocation7], 1536  }
  0x32   :  { %3028 = vsyncadd [#allocation7], 4294965760 }
  0x33   :  { %3029 = dma.done.wait [#allocation10], 512  }
  0x34   :  { %3030 = vsyncadd [#allocation10], 4294966784  ;;  %v3041_v0 = vmov 0.0   ;;  %vm3042_vm0 = vmmov 0   ;;  %v3117_v1 = vld [vmem:[#allocation6 + $0x18] sm:$0xff]  ;;  %v3119_v2 = vld [vmem:[#allocation6 + $0x10] sm:$0xff] }
  0x35   :  { %2465 = vmatprep.subr.mxu0 %v3041_v0  ;;  %2473 = vmatprep.mubr.msk.f32.mxu0 %vm3042_vm0, %v3041_v0  ;;  %v3123_v3 = vld [vmem:[#allocation6 + $0x8] sm:$0xff]  ;;  %v3127_v4 = vld [vmem:[#allocation6] sm:$0xff]  ;;  %s3043_s3 = smov 64   ;;  %v3149_v19 = vld [vmem:[#allocation8 + $0x38] sm:$0xff]  ;;  %vm102_vm1 = vcmask 261120   ;;  %vm206_vm2 = vcmask 523264  }
  0x36   :  { %2476 = vmatprep.subr.mxu1 %v3041_v0  ;;  %2492 = vmatprep.mubr.msk.f32.mxu1 %vm3042_vm0, %v3041_v0  ;;  %v101_v5 = vld [vmem:[#allocation3] sm:$0x3]  ;;  %v3151_v20 = vld [vmem:[#allocation8 + $0x30] sm:$0xff]  ;;  %v3159_v22 = vld [vmem:[#allocation8 + $0x20] sm:$0xff]  ;;  %vm308_vm9 = vcmask 254976  }
  0x37   :  { %2466 = vmatpush3.msra.mxu0 %v3117_v1  ;;  %2477 = vmatpush3.msra.mxu1 %v3149_v19  ;;  %v3155_v21 = vld [vmem:[#allocation8 + $0x28] sm:$0xff]  ;;  %v3163_v23 = vld [vmem:[#allocation8 + $0x18] sm:$0xff]  ;;  %v3167_v24 = vld [vmem:[#allocation8 + $0x10] sm:$0xff] }
  0x38   :  { %2467 = vmatprep.subr.mxu0 %v3041_v0  ;;  %2478 = vmatprep.subr.mxu1 %v3041_v0  ;;  %v3171_v26 = vld [vmem:[#allocation8 + $0x8] sm:$0xff]  ;;  %v3178_v27 = vld [vmem:[#allocation8] sm:$0xff]  ;;  %v311_v32 = vld [vmem:[#allocation3 + $0x2] sm:$0x3] }
  0x39   :  { %2468 = vmatpush3.msra.mxu0 %v3119_v2  ;;  %2479 = vmatpush3.msra.mxu1 %v3151_v20  ;;  %v3217_v33 = vld [vmem:[%s3695_s4] ss:$0 sm:$0xff] }
  0x3a   :  { %2469 = vmatprep.subr.mxu0 %v3041_v0  ;;  %2480 = vmatprep.subr.mxu1 %v3041_v0 }
  0x3b   :  { %2470 = vmatpush3.msra.mxu0 %v3123_v3  ;;  %2481 = vmatpush3.msra.mxu1 %v3155_v21 }
  0x3c   :  { %2471 = vmatprep.subr.mxu0 %v3041_v0  ;;  %2482 = vmatprep.subr.mxu1 %v3041_v0 }
  0x3d   :  { %2472 = vmatpush3.msra.mxu0 %v3127_v4  ;;  %2483 = vmatpush3.msra.mxu1 %v3159_v22 }
  0x3e   :  { %2474 = vmatmul.mubr.f32.vlgmr.msra.gmra.mxu0 %v3041_v0  ;;  %2495 = vmatprep.subr.mxu0 %v3041_v0 }
  0x3f   :  { %2496 = vmatpush3.msra.mxu0 %v3117_v1  ;;  %2503 = vmatprep.mubr.msk.f32.mxu0 %vm3042_vm0, %v3041_v0 }
  0x40   :  { %2497 = vmatprep.subr.mxu0 %v3041_v0  ;;  %2484 = vmatprep.subr.mxu1 %v3041_v0 }
  0x41   :  { %2498 = vmatpush3.msra.mxu0 %v3119_v2  ;;  %2485 = vmatpush3.msra.mxu1 %v3163_v23 }
  0x42   :  { %2499 = vmatprep.subr.mxu0 %v3041_v0  ;;  %2486 = vmatprep.subr.mxu1 %v3041_v0 }
  0x43   :  { %2500 = vmatpush3.msra.mxu0 %v3123_v3  ;;  %2487 = vmatpush3.msra.mxu1 %v3167_v24 }
  0x44   :  { %2501 = vmatprep.subr.mxu0 %v3041_v0  ;;  %2488 = vmatprep.subr.mxu1 %v3041_v0 }
  0x45   :  { %2502 = vmatpush3.msra.mxu0 %v3127_v4  ;;  %2489 = vmatpush3.msra.mxu1 %v3171_v26 }
  0x46   :  { %2506 = vmatprep.subr.mxu0 %v3041_v0  ;;  %2490 = vmatprep.subr.mxu1 %v3041_v0 }
  0x47   :  { %2491 = vmatpush3.msra.mxu1 %v3178_v27 }
  0x48   :  { %2525 = vmatprep.subr.mxu1 %v3041_v0 }
  0xfe   :  { %v172_v6 = vpop.f32.mrf.mxu0 }
  0xff   :  { %v176_v7 = vadd.f32 %v172_v6, %v101_v5 }
 0x100   :  { %v2475_v8 = vpop.f32.mrf.mxu0 }
 0x101   :  { %2768 = vtanh.f32 %v176_v7  ;;  %v2293_v10 = vmul.f32 -1.442695, %v176_v7 }
 0x103   :  { %2770 = vpow2.f32 %v2293_v10  ;;  %v521_v10 = vld [vmem:[#allocation3 + $0x4] sm:$0x3] }
 0x10e   :  { %v2769_v9 = vpop.eup %2768 }
 0x10f   :  { %186 = vrot.lane.b32.xlu0 %v2769_v9, %s3043_s3 }
 0x110   :  { %v2771_v11 = vpop.eup %2770 }
 0x111   :  { %v180_v12 = vadd.f32 1.0, %v2771_v11 }
 0x113   :  { %2772 = vrcp.f32 %v180_v12 }
 0x120   :  { %v2773_v13 = vpop.eup %2772 }
 0x121   :  { %v184_v16 = vmul.f32 0.0, %v2773_v13 }
 0x181   :  { %v187_v14 = vpop.permute.xlu0 %186 }
 0x182   :  { %v189_v15 = vmul.f32 %v2773_v13, %v187_v14 }
 0x184   :  { %191 = vrot.lane.b32.xlu0 %v189_v15, %s3037_s11 }
 0x1f6   :  { %v192_v17 = vpop.permute.xlu0 %191 }
 0x1f7   :  { %v3146_v18 = vadd.f32 %v192_v17, %v184_v16 }
 0x1f9   :  { %2774 = vtanh.f32 %v3146_v18 }
 0x206   :  { %v2775_v25 = vpop.eup %2774 }
 0x207   :  { %197 = vrot.lane.b32.xlu1 %v2775_v25, %s3043_s3 }
 0x279   :  { %v198_v28 = vpop.permute.xlu1 %197 }
 0x27a   :  { %v200_v29 = vmul.f32 %v2773_v13, %v198_v28 }
 0x27c   :  { %202 = vrot.lane.b32.xlu1 %v200_v29, %s3037_s11 }
 0x2ee   :  { %v203_v30 = vpop.permute.xlu1 %202 }
 0x2ef   :  { %v205_v31 = vsel %vm102_vm1, %v203_v30, 0.0  ;;  %2504 = vmatmul.mubr.msk.f32.vlgmr.msra.gmra.mxu0 %vm102_vm1, %v203_v30 }
 0x2f0   :  { %2493 = vmatmul.mubr.msk.f32.vlgmr.msra.gmra.mxu1 %vm206_vm2, %v205_v31  ;;  %2507 = vmatpush3.msra.mxu0 %v3149_v19 }
 0x2f1   :  { %2508 = vmatprep.subr.mxu0 %v3041_v0  ;;  %2526 = vmatpush3.msra.mxu1 %v3117_v1 }
 0x2f2   :  { %2509 = vmatpush3.msra.mxu0 %v3151_v20  ;;  %2527 = vmatprep.subr.mxu1 %v3041_v0 }
 0x2f3   :  { %2510 = vmatprep.subr.mxu0 %v3041_v0  ;;  %2528 = vmatpush3.msra.mxu1 %v3119_v2 }
 0x2f4   :  { %2511 = vmatpush3.msra.mxu0 %v3155_v21  ;;  %2529 = vmatprep.subr.mxu1 %v3041_v0 }
 0x2f5   :  { %2512 = vmatprep.subr.mxu0 %v3041_v0  ;;  %2530 = vmatpush3.msra.mxu1 %v3123_v3 }
 0x2f6   :  { %2513 = vmatpush3.msra.mxu0 %v3159_v22  ;;  %2531 = vmatprep.subr.mxu1 %v3041_v0 }
 0x2f7   :  { %2514 = vmatprep.subr.mxu0 %v3041_v0  ;;  %2532 = vmatpush3.msra.mxu1 %v3127_v4 }
 0x2f8   :  { %2515 = vmatpush3.msra.mxu0 %v3163_v23  ;;  %2533 = vmatprep.mubr.msk.f32.mxu1 %vm3042_vm0, %v3041_v0 }
 0x2f9   :  { %2516 = vmatprep.subr.mxu0 %v3041_v0  ;;  %2522 = vmatprep.mubr.msk.f32.mxu0 %vm3042_vm0, %v3041_v0 }
 0x2fa   :  { %2517 = vmatpush3.msra.mxu0 %v3167_v24  ;;  %2536 = vmatprep.subr.mxu1 %v3041_v0 }
 0x2fb   :  { %2518 = vmatprep.subr.mxu0 %v3041_v0 }
 0x2fc   :  { %2519 = vmatpush3.msra.mxu0 %v3171_v26 }
 0x2fd   :  { %2520 = vmatprep.subr.mxu0 %v3041_v0 }
 0x2fe   :  { %2521 = vmatpush3.msra.mxu0 %v3178_v27 }
 0x2ff   :  { %2555 = vmatprep.subr.mxu0 %v3041_v0 }
 0x3af   :  { %v380_v34 = vpop.f32.mrf.mxu0 }
 0x3b0   :  { %v384_v35 = vadd.f32 %v380_v34, %v311_v32  ;;  %v276_v36 = vpop.f32.mrf.mxu1 }
 0x3b1   :  { %v277_v37 = vadd.f32 %v3217_v33, %v276_v36  ;;  %v2505_v38 = vpop.f32.mrf.mxu0 }
 0x3b2   :  { %2776 = vtanh.f32 %v384_v35  ;;  %v2494_v39 = vpop.f32.mrf.mxu1  ;;  %v2297_v42 = vmul.f32 -1.442695, %v384_v35 }
 0x3b3   :  { %2778 = vtanh.f32 %v277_v37  ;;  %v2295_v43 = vmul.f32 -1.442695, %v277_v37 }
 0x3b4   :  { %2780 = vpow2.f32 %v2297_v42 }
 0x3b5   :  { %2782 = vpow2.f32 %v2295_v43 }
 0x3bf   :  { %v2777_v40 = vpop.eup %2776 }
 0x3c0   :  { %v2779_v41 = vpop.eup %2778  ;;  %394 = vrot.lane.b32.xlu1 %v2777_v40, %s3043_s3 }
 0x3c1   :  { %289 = vrot.lane.b32.xlu0 %v2779_v41, %s3043_s3  ;;  %v2781_v44 = vpop.eup %2780 }
 0x3c2   :  { %v2783_v45 = vpop.eup %2782  ;;  %v388_v46 = vadd.f32 1.0, %v2781_v44 }
 0x3c3   :  { %v283_v47 = vadd.f32 1.0, %v2783_v45 }
 0x3c4   :  { %2784 = vrcp.f32 %v388_v46 }
 0x3c5   :  { %2786 = vrcp.f32 %v283_v47 }
 0x3d1   :  { %v2785_v48 = vpop.eup %2784 }
 0x3d2   :  { %v2787_v50 = vpop.eup %2786  ;;  %v392_v54 = vmul.f32 %v2785_v48, %v3146_v18 }
 0x3d3   :  { %v287_v56 = vmul.f32 0.0, %v2787_v50 }
 0x432   :  { %v395_v49 = vpop.permute.xlu1 %394 }
 0x433   :  { %v397_v51 = vmul.f32 %v2785_v48, %v395_v49  ;;  %v290_v52 = vpop.permute.xlu0 %289 }
 0x434   :  { %v292_v53 = vmul.f32 %v2787_v50, %v290_v52 }
 0x435   :  { %399 = vrot.lane.b32.xlu1 %v397_v51, %s3037_s11 }
 0x436   :  { %294 = vrot.lane.b32.xlu0 %v292_v53, %s3037_s11 }
 0x4a7   :  { %v400_v55 = vpop.permute.xlu1 %399 }
 0x4a8   :  { %v3225_v57 = vadd.f32 %v400_v55, %v392_v54  ;;  %v295_v58 = vpop.permute.xlu0 %294  ;;  %v731_v55 = vld [vmem:[#allocation3 + $0x6] sm:$0x3] }
 0x4a9   :  { %v3227_v59 = vadd.f32 %v295_v58, %v287_v56 }
 0x4aa   :  { %2788 = vtanh.f32 %v3225_v57 }
 0x4ab   :  { %2790 = vtanh.f32 %v3227_v59 }
 0x4b7   :  { %v2789_v60 = vpop.eup %2788 }
 0x4b8   :  { %v2791_v61 = vpop.eup %2790  ;;  %405 = vrot.lane.b32.xlu1 %v2789_v60, %s3043_s3 }
 0x4b9   :  { %300 = vrot.lane.b32.xlu0 %v2791_v61, %s3043_s3 }
 0x52a   :  { %v406_v62 = vpop.permute.xlu1 %405 }
 0x52b   :  { %v408_v63 = vmul.f32 %v2785_v48, %v406_v62  ;;  %v301_v5 = vpop.permute.xlu0 %300 }
 0x52c   :  { %v3233_v6 = vmul.f32 %v2787_v50, %v301_v5 }
 0x52d   :  { %410 = vrot.lane.b32.xlu0 %v408_v63, %s3037_s11 }
 0x52e   :  { %413 = vrot.lane.b32.xlu1 %v3233_v6, %s3043_s3 }
 0x59f   :  { %v411_v7 = vpop.permute.xlu0 %410 }
 0x5a0   :  { %2534 = vmatmul.mubr.msk.f32.vlgmr.msra.gmra.mxu1 %vm102_vm1, %v411_v7  ;;  %v414_v8 = vpop.permute.xlu1 %413 }
 0x5a1   :  { %v416_v9 = vsel %vm102_vm1, %v411_v7, %v414_v8  ;;  %2537 = vmatpush3.msra.mxu1 %v3149_v19  ;;  %2552 = vmatprep.mubr.msk.f32.mxu1 %vm3042_vm0, %v3041_v0 }
 0x5a2   :  { %2523 = vmatmul.mubr.msk.f32.vlgmr.msra.gmra.mxu0 %vm206_vm2, %v416_v9  ;;  %2538 = vmatprep.subr.mxu1 %v3041_v0 }
 0x5a3   :  { %2539 = vmatpush3.msra.mxu1 %v3151_v20  ;;  %2556 = vmatpush3.msra.mxu0 %v3117_v1 }
 0x5a4   :  { %2540 = vmatprep.subr.mxu1 %v3041_v0  ;;  %2557 = vmatprep.subr.mxu0 %v3041_v0 }
 0x5a5   :  { %2541 = vmatpush3.msra.mxu1 %v3155_v21  ;;  %2558 = vmatpush3.msra.mxu0 %v3119_v2 }
 0x5a6   :  { %2542 = vmatprep.subr.mxu1 %v3041_v0  ;;  %2559 = vmatprep.subr.mxu0 %v3041_v0 }
 0x5a7   :  { %2543 = vmatpush3.msra.mxu1 %v3159_v22  ;;  %2560 = vmatpush3.msra.mxu0 %v3123_v3 }
 0x5a8   :  { %2544 = vmatprep.subr.mxu1 %v3041_v0  ;;  %2561 = vmatprep.subr.mxu0 %v3041_v0 }
 0x5a9   :  { %2545 = vmatpush3.msra.mxu1 %v3163_v23  ;;  %2562 = vmatpush3.msra.mxu0 %v3127_v4 }
 0x5aa   :  { %2546 = vmatprep.subr.mxu1 %v3041_v0  ;;  %2563 = vmatprep.mubr.msk.f32.mxu0 %vm3042_vm0, %v3041_v0 }
 0x5ab   :  { %2547 = vmatpush3.msra.mxu1 %v3167_v24  ;;  %2566 = vmatprep.subr.mxu0 %v3041_v0 }
 0x5ac   :  { %2548 = vmatprep.subr.mxu1 %v3041_v0 }
 0x5ad   :  { %2549 = vmatpush3.msra.mxu1 %v3171_v26 }
 0x5ae   :  { %2550 = vmatprep.subr.mxu1 %v3041_v0 }
 0x5af   :  { %2551 = vmatpush3.msra.mxu1 %v3178_v27 }
 0x5b0   :  { %2585 = vmatprep.subr.mxu1 %v3041_v0 }
 0x660   :  { %v590_v11 = vpop.f32.mrf.mxu1 }
 0x661   :  { %v594_v12 = vadd.f32 %v590_v11, %v521_v10 }
 0x662   :  { %v486_v13 = vpop.f32.mrf.mxu0  ;;  %v2535_v14 = vpop.f32.mrf.mxu1 }
 0x663   :  { %2792 = vtanh.f32 %v594_v12  ;;  %v487_v15 = vadd.f32 %v3217_v33, %v486_v13  ;;  %v2301_v25 = vmul.f32 -1.442695, %v594_v12 }
 0x664   :  { %v2524_v16 = vpop.f32.mrf.mxu0 }
 0x665   :  { %2794 = vtanh.f32 %v487_v15  ;;  %v2299_v28 = vmul.f32 -1.442695, %v487_v15 }
 0x666   :  { %2796 = vpow2.f32 %v2301_v25 }
 0x667   :  { %2798 = vpow2.f32 %v2299_v28 }
 0x670   :  { %v2793_v17 = vpop.eup %2792 }
 0x671   :  { %604 = vrot.lane.b32.xlu1 %v2793_v17, %s3043_s3 }
 0x672   :  { %v2795_v18 = vpop.eup %2794 }
 0x673   :  { %499 = vrot.lane.b32.xlu0 %v2795_v18, %s3043_s3  ;;  %v2797_v29 = vpop.eup %2796 }
 0x674   :  { %v2799_v30 = vpop.eup %2798  ;;  %v598_v31 = vadd.f32 1.0, %v2797_v29 }
 0x675   :  { %v493_v32 = vadd.f32 1.0, %v2799_v30 }
 0x676   :  { %2800 = vrcp.f32 %v598_v31 }
 0x677   :  { %2802 = vrcp.f32 %v493_v32 }
 0x683   :  { %v2801_v34 = vpop.eup %2800 }
 0x684   :  { %v2803_v37 = vpop.eup %2802  ;;  %v602_v40 = vmul.f32 %v2801_v34, %v3225_v57 }
 0x685   :  { %v497_v43 = vmul.f32 %v2803_v37, %v3227_v59 }
 0x6e3   :  { %v605_v35 = vpop.permute.xlu1 %604 }
 0x6e4   :  { %v607_v36 = vmul.f32 %v2801_v34, %v605_v35 }
 0x6e5   :  { %v500_v38 = vpop.permute.xlu0 %499 }
 0x6e6   :  { %609 = vrot.lane.b32.xlu1 %v607_v36, %s3037_s11  ;;  %v502_v39 = vmul.f32 %v2803_v37, %v500_v38 }
 0x6e8   :  { %504 = vrot.lane.b32.xlu0 %v502_v39, %s3037_s11 }
 0x758   :  { %v610_v41 = vpop.permute.xlu1 %609 }
 0x759   :  { %v3275_v42 = vadd.f32 %v610_v41, %v602_v40 }
 0x75a   :  { %v505_v44 = vpop.permute.xlu0 %504 }
 0x75b   :  { %2804 = vtanh.f32 %v3275_v42  ;;  %v3279_v45 = vadd.f32 %v505_v44, %v497_v43 }
 0x75d   :  { %2806 = vtanh.f32 %v3279_v45 }
 0x768   :  { %v2805_v46 = vpop.eup %2804 }
 0x769   :  { %615 = vrot.lane.b32.xlu1 %v2805_v46, %s3043_s3 }
 0x76a   :  { %v2807_v47 = vpop.eup %2806 }
 0x76b   :  { %510 = vrot.lane.b32.xlu0 %v2807_v47, %s3043_s3 }
 0x7db   :  { %v616_v48 = vpop.permute.xlu1 %615 }
 0x7dc   :  { %v618_v49 = vmul.f32 %v2801_v34, %v616_v48 }
 0x7dd   :  { %v511_v50 = vpop.permute.xlu0 %510 }
 0x7de   :  { %620 = vrot.lane.b32.xlu0 %v618_v49, %s3037_s11  ;;  %v3285_v51 = vmul.f32 %v2803_v37, %v511_v50 }
 0x7e0   :  { %623 = vrot.lane.b32.xlu1 %v3285_v51, %s3043_s3 }
 0x850   :  { %v621_v52 = vpop.permute.xlu0 %620 }
 0x851   :  { %2564 = vmatmul.mubr.msk.f32.vlgmr.msra.gmra.mxu0 %vm102_vm1, %v621_v52 }
 0x852   :  { %2567 = vmatpush3.msra.mxu0 %v3149_v19  ;;  %2582 = vmatprep.mubr.msk.f32.mxu0 %vm3042_vm0, %v3041_v0  ;;  %v624_v53 = vpop.permute.xlu1 %623 }
 0x853   :  { %2568 = vmatprep.subr.mxu0 %v3041_v0  ;;  %v626_v54 = vsel %vm102_vm1, %v621_v52, %v624_v53 }
 0x854   :  { %2569 = vmatpush3.msra.mxu0 %v3151_v20  ;;  %2553 = vmatmul.mubr.msk.f32.vlgmr.msra.gmra.mxu1 %vm206_vm2, %v626_v54 }
 0x855   :  { %2570 = vmatprep.subr.mxu0 %v3041_v0  ;;  %2586 = vmatpush3.msra.mxu1 %v3117_v1 }
 0x856   :  { %2571 = vmatpush3.msra.mxu0 %v3155_v21  ;;  %2587 = vmatprep.subr.mxu1 %v3041_v0 }
 0x857   :  { %2572 = vmatprep.subr.mxu0 %v3041_v0  ;;  %2588 = vmatpush3.msra.mxu1 %v3119_v2 }
 0x858   :  { %2573 = vmatpush3.msra.mxu0 %v3159_v22  ;;  %2589 = vmatprep.subr.mxu1 %v3041_v0 }
 0x859   :  { %2574 = vmatprep.subr.mxu0 %v3041_v0  ;;  %2590 = vmatpush3.msra.mxu1 %v3123_v3 }
 0x85a   :  { %2575 = vmatpush3.msra.mxu0 %v3163_v23  ;;  %2591 = vmatprep.subr.mxu1 %v3041_v0 }
 0x85b   :  { %2576 = vmatprep.subr.mxu0 %v3041_v0  ;;  %2592 = vmatpush3.msra.mxu1 %v3127_v4 }
 0x85c   :  { %2577 = vmatpush3.msra.mxu0 %v3167_v24  ;;  %2593 = vmatprep.mubr.msk.f32.mxu1 %vm3042_vm0, %v3041_v0 }
 0x85d   :  { %2578 = vmatprep.subr.mxu0 %v3041_v0  ;;  %2596 = vmatprep.subr.mxu1 %v3041_v0 }
 0x85e   :  { %2579 = vmatpush3.msra.mxu0 %v3171_v26 }
 0x85f   :  { %2580 = vmatprep.subr.mxu0 %v3041_v0 }
 0x860   :  { %2581 = vmatpush3.msra.mxu0 %v3178_v27 }
 0x861   :  { %2615 = vmatprep.subr.mxu0 %v3041_v0 }
 0x911   :  { %v800_v56 = vpop.f32.mrf.mxu0 }
 0x912   :  { %v804_v57 = vadd.f32 %v800_v56, %v731_v55 }
 0x913   :  { %v2565_v58 = vpop.f32.mrf.mxu0 }
 0x914   :  { %2808 = vtanh.f32 %v804_v57  ;;  %v696_v59 = vpop.f32.mrf.mxu1  ;;  %v2305_v5 = vmul.f32 -1.442695, %v804_v57 }
 0x915   :  { %v697_v60 = vadd.f32 %v3217_v33, %v696_v59 }
 0x916   :  { %v2554_v61 = vpop.f32.mrf.mxu1 }
 0x917   :  { %2810 = vtanh.f32 %v697_v60  ;;  %v2303_v7 = vmul.f32 -1.442695, %v697_v60 }
 0x918   :  { %2812 = vpow2.f32 %v2305_v5 }
 0x919   :  { %2814 = vpow2.f32 %v2303_v7 }
 0x921   :  { %v2809_v62 = vpop.eup %2808 }
 0x922   :  { %814 = vrot.lane.b32.xlu1 %v2809_v62, %s3043_s3 }
 0x924   :  { %v2811_v63 = vpop.eup %2810 }
 0x925   :  { %709 = vrot.lane.b32.xlu0 %v2811_v63, %s3043_s3  ;;  %v2813_v8 = vpop.eup %2812 }
 0x926   :  { %v808_v9 = vadd.f32 1.0, %v2813_v8  ;;  %v2815_v10 = vpop.eup %2814 }
 0x927   :  { %v703_v11 = vadd.f32 1.0, %v2815_v10 }
 0x928   :  { %2816 = vrcp.f32 %v808_v9 }
 0x929   :  { %2818 = vrcp.f32 %v703_v11 }
 0x935   :  { %v2817_v12 = vpop.eup %2816 }
 0x936   :  { %v2819_v15 = vpop.eup %2818  ;;  %v812_v18 = vmul.f32 %v2817_v12, %v3275_v42  ;;  %v941_v42 = vld [vmem:[#allocation3 + $0x8] sm:$0x3] }
 0x937   :  { %v707_v29 = vmul.f32 %v2819_v15, %v3279_v45 }
 0x994   :  { %v815_v13 = vpop.permute.xlu1 %814 }
 0x995   :  { %v817_v14 = vmul.f32 %v2817_v12, %v815_v13 }
 0x997   :  { %819 = vrot.lane.b32.xlu1 %v817_v14, %s3037_s11  ;;  %v710_v16 = vpop.permute.xlu0 %709 }
 0x998   :  { %v712_v17 = vmul.f32 %v2819_v15, %v710_v16 }
 0x99a   :  { %714 = vrot.lane.b32.xlu0 %v712_v17, %s3037_s11 }
 0xa09   :  { %v820_v25 = vpop.permute.xlu1 %819 }
 0xa0a   :  { %v3326_v28 = vadd.f32 %v820_v25, %v812_v18 }
 0xa0c   :  { %2820 = vtanh.f32 %v3326_v28  ;;  %v715_v30 = vpop.permute.xlu0 %714 }
 0xa0d   :  { %v3330_v31 = vadd.f32 %v715_v30, %v707_v29  ;;  %v1151_v29 = vld [vmem:[#allocation3 + $0xa] sm:$0x3] }
 0xa0f   :  { %2822 = vtanh.f32 %v3330_v31 }
 0xa19   :  { %v2821_v32 = vpop.eup %2820 }
 0xa1a   :  { %825 = vrot.lane.b32.xlu1 %v2821_v32, %s3043_s3 }
 0xa1c   :  { %v2823_v34 = vpop.eup %2822 }
 0xa1d   :  { %720 = vrot.lane.b32.xlu0 %v2823_v34, %s3043_s3 }
 0xa8c   :  { %v826_v35 = vpop.permute.xlu1 %825 }
 0xa8d   :  { %v828_v36 = vmul.f32 %v2817_v12, %v826_v35 }
 0xa8f   :  { %830 = vrot.lane.b32.xlu0 %v828_v36, %s3037_s11  ;;  %v721_v37 = vpop.permute.xlu0 %720 }
 0xa90   :  { %v3336_v38 = vmul.f32 %v2819_v15, %v721_v37 }
 0xa92   :  { %833 = vrot.lane.b32.xlu1 %v3336_v38, %s3043_s3 }
 0xb01   :  { %v831_v39 = vpop.permute.xlu0 %830 }
 0xb02   :  { %2594 = vmatmul.mubr.msk.f32.vlgmr.msra.gmra.mxu1 %vm102_vm1, %v831_v39 }
 0xb03   :  { %2597 = vmatpush3.msra.mxu1 %v3149_v19  ;;  %2612 = vmatprep.mubr.msk.f32.mxu1 %vm3042_vm0, %v3041_v0 }
 0xb04   :  { %2598 = vmatprep.subr.mxu1 %v3041_v0  ;;  %v834_v40 = vpop.permute.xlu1 %833 }
 0xb05   :  { %2599 = vmatpush3.msra.mxu1 %v3151_v20  ;;  %v836_v41 = vsel %vm102_vm1, %v831_v39, %v834_v40 }
 0xb06   :  { %2600 = vmatprep.subr.mxu1 %v3041_v0  ;;  %2583 = vmatmul.mubr.msk.f32.vlgmr.msra.gmra.mxu0 %vm206_vm2, %v836_v41 }
 0xb07   :  { %2601 = vmatpush3.msra.mxu1 %v3155_v21  ;;  %2616 = vmatpush3.msra.mxu0 %v3117_v1 }
 0xb08   :  { %2602 = vmatprep.subr.mxu1 %v3041_v0  ;;  %2617 = vmatprep.subr.mxu0 %v3041_v0 }
 0xb09   :  { %2603 = vmatpush3.msra.mxu1 %v3159_v22  ;;  %2618 = vmatpush3.msra.mxu0 %v3119_v2 }
 0xb0a   :  { %2604 = vmatprep.subr.mxu1 %v3041_v0  ;;  %2619 = vmatprep.subr.mxu0 %v3041_v0 }
 0xb0b   :  { %2605 = vmatpush3.msra.mxu1 %v3163_v23  ;;  %2620 = vmatpush3.msra.mxu0 %v3123_v3 }
 0xb0c   :  { %2606 = vmatprep.subr.mxu1 %v3041_v0  ;;  %2621 = vmatprep.subr.mxu0 %v3041_v0 }
 0xb0d   :  { %2623 = vmatprep.mubr.msk.f32.mxu0 %vm3042_vm0, %v3041_v0  ;;  %2622 = vmatpush3.msra.mxu0 %v3127_v4 }
 0xb0e   :  { %2607 = vmatpush3.msra.mxu1 %v3167_v24  ;;  %2626 = vmatprep.subr.mxu0 %v3041_v0 }
 0xb0f   :  { %2608 = vmatprep.subr.mxu1 %v3041_v0 }
 0xb10   :  { %2609 = vmatpush3.msra.mxu1 %v3171_v26 }
 0xb11   :  { %2610 = vmatprep.subr.mxu1 %v3041_v0 }
 0xb12   :  { %2611 = vmatpush3.msra.mxu1 %v3178_v27 }
 0xb13   :  { %2645 = vmatprep.subr.mxu1 %v3041_v0 }
 0xbc2   :  { %v1010_v43 = vpop.f32.mrf.mxu1 }
 0xbc3   :  { %v1014_v44 = vadd.f32 %v1010_v43, %v941_v42 }
 0xbc4   :  { %v2595_v45 = vpop.f32.mrf.mxu1 }
 0xbc5   :  { %2824 = vtanh.f32 %v1014_v44  ;;  %v2309_v52 = vmul.f32 -1.442695, %v1014_v44 }
 0xbc6   :  { %v906_v46 = vpop.f32.mrf.mxu0 }
 0xbc7   :  { %v907_v47 = vadd.f32 %v3217_v33, %v906_v46 }
 0xbc8   :  { %v2584_v48 = vpop.f32.mrf.mxu0 }
 0xbc9   :  { %2826 = vtanh.f32 %v907_v47  ;;  %v2307_v53 = vmul.f32 -1.442695, %v907_v47 }
 0xbca   :  { %2828 = vpow2.f32 %v2309_v52 }
 0xbcb   :  { %2830 = vpow2.f32 %v2307_v53 }
 0xbd2   :  { %v2825_v49 = vpop.eup %2824 }
 0xbd3   :  { %1024 = vrot.lane.b32.xlu1 %v2825_v49, %s3043_s3 }
 0xbd6   :  { %v2827_v50 = vpop.eup %2826 }
 0xbd7   :  { %919 = vrot.lane.b32.xlu0 %v2827_v50, %s3043_s3  ;;  %v2829_v54 = vpop.eup %2828 }
 0xbd8   :  { %v1018_v55 = vadd.f32 1.0, %v2829_v54  ;;  %v2831_v56 = vpop.eup %2830 }
 0xbd9   :  { %v913_v57 = vadd.f32 1.0, %v2831_v56 }
 0xbda   :  { %2832 = vrcp.f32 %v1018_v55 }
 0xbdb   :  { %2834 = vrcp.f32 %v913_v57 }
 0xbe7   :  { %v2833_v58 = vpop.eup %2832 }
 0xbe8   :  { %v2835_v61 = vpop.eup %2834  ;;  %v1022_v5 = vmul.f32 %v2833_v58, %v3326_v28 }
 0xbe9   :  { %v917_v9 = vmul.f32 %v2835_v61, %v3330_v31 }
 0xc45   :  { %v1025_v59 = vpop.permute.xlu1 %1024 }
 0xc46   :  { %v1027_v60 = vmul.f32 %v2833_v58, %v1025_v59 }
 0xc48   :  { %1029 = vrot.lane.b32.xlu1 %v1027_v60, %s3037_s11 }
 0xc49   :  { %v920_v62 = vpop.permute.xlu0 %919 }
 0xc4a   :  { %v922_v63 = vmul.f32 %v2835_v61, %v920_v62 }
 0xc4c   :  { %924 = vrot.lane.b32.xlu0 %v922_v63, %s3037_s11 }
 0xcba   :  { %v1030_v7 = vpop.permute.xlu1 %1029 }
 0xcbb   :  { %v3377_v8 = vadd.f32 %v1030_v7, %v1022_v5 }
 0xcbd   :  { %2836 = vtanh.f32 %v3377_v8 }
 0xcbe   :  { %v925_v10 = vpop.permute.xlu0 %924 }
 0xcbf   :  { %v3381_v11 = vadd.f32 %v925_v10, %v917_v9 }
 0xcc1   :  { %2838 = vtanh.f32 %v3381_v11 }
 0xcca   :  { %v2837_v12 = vpop.eup %2836 }
 0xccb   :  { %1035 = vrot.lane.b32.xlu1 %v2837_v12, %s3043_s3 }
 0xcce   :  { %v2839_v13 = vpop.eup %2838 }
 0xccf   :  { %930 = vrot.lane.b32.xlu0 %v2839_v13, %s3043_s3 }
 0xd3d   :  { %v1036_v14 = vpop.permute.xlu1 %1035 }
 0xd3e   :  { %v1038_v15 = vmul.f32 %v2833_v58, %v1036_v14 }
 0xd40   :  { %1040 = vrot.lane.b32.xlu0 %v1038_v15, %s3037_s11 }
 0xd41   :  { %v931_v16 = vpop.permute.xlu0 %930 }
 0xd42   :  { %v3387_v17 = vmul.f32 %v2835_v61, %v931_v16 }
 0xd44   :  { %1043 = vrot.lane.b32.xlu1 %v3387_v17, %s3043_s3 }
 0xdb2   :  { %v1041_v18 = vpop.permute.xlu0 %1040 }
 0xdb3   :  { %2624 = vmatmul.mubr.msk.f32.vlgmr.msra.gmra.mxu0 %vm102_vm1, %v1041_v18 }
 0xdb4   :  { %2627 = vmatpush3.msra.mxu0 %v3149_v19  ;;  %2642 = vmatprep.mubr.msk.f32.mxu0 %vm3042_vm0, %v3041_v0 }
 0xdb5   :  { %2628 = vmatprep.subr.mxu0 %v3041_v0 }
 0xdb6   :  { %2629 = vmatpush3.msra.mxu0 %v3151_v20  ;;  %v1044_v25 = vpop.permute.xlu1 %1043 }
 0xdb7   :  { %2630 = vmatprep.subr.mxu0 %v3041_v0  ;;  %v1046_v28 = vsel %vm102_vm1, %v1041_v18, %v1044_v25 }
 0xdb8   :  { %2631 = vmatpush3.msra.mxu0 %v3155_v21  ;;  %2613 = vmatmul.mubr.msk.f32.vlgmr.msra.gmra.mxu1 %vm206_vm2, %v1046_v28 }
 0xdb9   :  { %2632 = vmatprep.subr.mxu0 %v3041_v0  ;;  %2646 = vmatpush3.msra.mxu1 %v3117_v1 }
 0xdba   :  { %2633 = vmatpush3.msra.mxu0 %v3159_v22  ;;  %2647 = vmatprep.subr.mxu1 %v3041_v0 }
 0xdbb   :  { %2634 = vmatprep.subr.mxu0 %v3041_v0  ;;  %2648 = vmatpush3.msra.mxu1 %v3119_v2 }
 0xdbc   :  { %2635 = vmatpush3.msra.mxu0 %v3163_v23  ;;  %2649 = vmatprep.subr.mxu1 %v3041_v0 }
 0xdbd   :  { %2653 = vmatprep.mubr.msk.f32.mxu1 %vm3042_vm0, %v3041_v0  ;;  %2650 = vmatpush3.msra.mxu1 %v3123_v3 }
 0xdbe   :  { %2636 = vmatprep.subr.mxu0 %v3041_v0  ;;  %2651 = vmatprep.subr.mxu1 %v3041_v0 }
 0xdbf   :  { %2637 = vmatpush3.msra.mxu0 %v3167_v24  ;;  %2652 = vmatpush3.msra.mxu1 %v3127_v4 }
 0xdc0   :  { %2638 = vmatprep.subr.mxu0 %v3041_v0  ;;  %2656 = vmatprep.subr.mxu1 %v3041_v0 }
 0xdc1   :  { %2639 = vmatpush3.msra.mxu0 %v3171_v26 }
 0xdc2   :  { %2640 = vmatprep.subr.mxu0 %v3041_v0 }
 0xdc3   :  { %2641 = vmatpush3.msra.mxu0 %v3178_v27 }
 0xdc4   :  { %2675 = vmatprep.subr.mxu0 %v3041_v0 }
 0xe73   :  { %v1220_v30 = vpop.f32.mrf.mxu0 }
 0xe74   :  { %v1224_v31 = vadd.f32 %v1220_v30, %v1151_v29 }
 0xe75   :  { %v2625_v32 = vpop.f32.mrf.mxu0 }
 0xe76   :  { %2840 = vtanh.f32 %v1224_v31  ;;  %v2313_v40 = vmul.f32 -1.442695, %v1224_v31 }
 0xe78   :  { %v1116_v34 = vpop.f32.mrf.mxu1 }
 0xe79   :  { %v1117_v35 = vadd.f32 %v3217_v33, %v1116_v34 }
 0xe7a   :  { %v2614_v36 = vpop.f32.mrf.mxu1 }
 0xe7b   :  { %2842 = vtanh.f32 %v1117_v35  ;;  %v2311_v41 = vmul.f32 -1.442695, %v1117_v35 }
 0xe7c   :  { %2844 = vpow2.f32 %v2313_v40 }
 0xe7d   :  { %2846 = vpow2.f32 %v2311_v41 }
 0xe83   :  { %v2841_v37 = vpop.eup %2840 }
 0xe84   :  { %1234 = vrot.lane.b32.xlu1 %v2841_v37, %s3043_s3 }
 0xe88   :  { %v2843_v39 = vpop.eup %2842 }
 0xe89   :  { %1129 = vrot.lane.b32.xlu0 %v2843_v39, %s3043_s3  ;;  %v2845_v42 = vpop.eup %2844 }
 0xe8a   :  { %v1228_v43 = vadd.f32 1.0, %v2845_v42  ;;  %v2847_v44 = vpop.eup %2846 }
 0xe8b   :  { %v1123_v45 = vadd.f32 1.0, %v2847_v44  ;;  %v3500_v44 = vld [vmem:[#allocation8 + $0x30] sm:$0xff] }
 0xe8c   :  { %2848 = vrcp.f32 %v1228_v43  ;;  %v3494_v43 = vld [vmem:[#allocation8 + $0x38] sm:$0xff] }
 0xe8d   :  { %2850 = vrcp.f32 %v1123_v45  ;;  %v3504_v45 = vld [vmem:[#allocation8 + $0x28] sm:$0xff] }
 0xe99   :  { %v2849_v46 = vpop.eup %2848 }
 0xe9a   :  { %v2851_v49 = vpop.eup %2850  ;;  %v1232_v53 = vmul.f32 %v2849_v46, %v3377_v8 }
 0xe9b   :  { %v1127_v56 = vmul.f32 %v2851_v49, %v3381_v11 }
 0xef6   :  { %v1235_v47 = vpop.permute.xlu1 %1234 }
 0xef7   :  { %v1237_v48 = vmul.f32 %v2849_v46, %v1235_v47 }
 0xef9   :  { %1239 = vrot.lane.b32.xlu1 %v1237_v48, %s3037_s11  ;;  %v3509_v48 = vld [vmem:[#allocation8 + $0x20] sm:$0xff] }
 0xefb   :  { %v1130_v50 = vpop.permute.xlu0 %1129 }
 0xefc   :  { %v1132_v52 = vmul.f32 %v2851_v49, %v1130_v50  ;;  %v3517_v50 = vld [vmem:[#allocation8 + $0x18] sm:$0xff] }
 0xefe   :  { %1134 = vrot.lane.b32.xlu0 %v1132_v52, %s3037_s11  ;;  %v2918_v52 = vld [vmem:[#allocation6 + $0x10] sm:$0xff] }
 0xf6b   :  { %v1240_v54 = vpop.permute.xlu1 %1239 }
 0xf6c   :  { %v3428_v55 = vadd.f32 %v1240_v54, %v1232_v53  ;;  %v3522_v53 = vld [vmem:[#allocation8 + $0x10] sm:$0xff]  ;;  %v2920_v54 = vld [vmem:[#allocation6 + $0x8] sm:$0xff] }
 0xf6e   :  { %2852 = vtanh.f32 %v3428_v55 }
 0xf70   :  { %v1135_v57 = vpop.permute.xlu0 %1134 }
 0xf71   :  { %v3432_v58 = vadd.f32 %v1135_v57, %v1127_v56  ;;  %v2922_v56 = vld [vmem:[#allocation6] sm:$0xff] }
 0xf72   :  { %v3531_v57 = vld [vmem:[#allocation8] sm:$0xff] }
 0xf73   :  { %2854 = vtanh.f32 %v3432_v58 }
 0xf7b   :  { %v2853_v59 = vpop.eup %2852 }
 0xf7c   :  { %1245 = vrot.lane.b32.xlu1 %v2853_v59, %s3043_s3 }
 0xf80   :  { %v2855_v60 = vpop.eup %2854 }
 0xf81   :  { %1140 = vrot.lane.b32.xlu0 %v2855_v60, %s3043_s3 }
 0xfee   :  { %v1246_v61 = vpop.permute.xlu1 %1245 }
 0xfef   :  { %v1248_v62 = vmul.f32 %v2849_v46, %v1246_v61 }
 0xff1   :  { %1250 = vrot.lane.b32.xlu0 %v1248_v62, %s3037_s11 }
 0xff3   :  { %v1141_v63 = vpop.permute.xlu0 %1140 }
 0xff4   :  { %v3438_v5 = vmul.f32 %v2851_v49, %v1141_v63  ;;  %v2916_v49 = vld [vmem:[#allocation6 + $0x18] sm:$0xff] }
 0xff6   :  { %1253 = vrot.lane.b32.xlu1 %v3438_v5, %s3043_s3 }
0x1063   :  { %v1251_v7 = vpop.permute.xlu0 %1250 }
0x1064   :  { %2654 = vmatmul.mubr.msk.f32.vlgmr.msra.gmra.mxu1 %vm102_vm1, %v1251_v7 }
0x1065   :  { %2657 = vmatpush3.msra.mxu1 %v3149_v19  ;;  %2672 = vmatprep.mubr.msk.f32.mxu1 %vm3042_vm0, %v3041_v0 }
0x1066   :  { %2658 = vmatprep.subr.mxu1 %v3041_v0 }
0x1067   :  { %2659 = vmatpush3.msra.mxu1 %v3151_v20 }
0x1068   :  { %2660 = vmatprep.subr.mxu1 %v3041_v0  ;;  %v1254_v8 = vpop.permute.xlu1 %1253 }
0x1069   :  { %2661 = vmatpush3.msra.mxu1 %v3155_v21  ;;  %v1256_v9 = vsel %vm102_vm1, %v1251_v7, %v1254_v8 }
0x106a   :  { %2662 = vmatprep.subr.mxu1 %v3041_v0  ;;  %2643 = vmatmul.mubr.msk.f32.vlgmr.msra.gmra.mxu0 %vm206_vm2, %v1256_v9 }
0x106b   :  { %2663 = vmatpush3.msra.mxu1 %v3159_v22  ;;  %2676 = vmatpush3.msra.mxu0 %v3117_v1  ;;  %v1361_v1 = vld [vmem:[#allocation3 + $0xc] sm:$0x3] }
0x106c   :  { %2664 = vmatprep.subr.mxu1 %v3041_v0  ;;  %2677 = vmatprep.subr.mxu0 %v3041_v0 }
0x106d   :  { %2683 = vmatprep.mubr.msk.f32.mxu0 %vm3042_vm0, %v3041_v0  ;;  %2678 = vmatpush3.msra.mxu0 %v3119_v2 }
0x106e   :  { %2665 = vmatpush3.msra.mxu1 %v3163_v23  ;;  %2679 = vmatprep.subr.mxu0 %v3041_v0 }
0x106f   :  { %2666 = vmatprep.subr.mxu1 %v3041_v0  ;;  %2680 = vmatpush3.msra.mxu0 %v3123_v3 }
0x1070   :  { %2667 = vmatpush3.msra.mxu1 %v3167_v24  ;;  %2681 = vmatprep.subr.mxu0 %v3041_v0 }
0x1071   :  { %2668 = vmatprep.subr.mxu1 %v3041_v0  ;;  %2682 = vmatpush3.msra.mxu0 %v3127_v4 }
0x1072   :  { %2669 = vmatpush3.msra.mxu1 %v3171_v26  ;;  %2686 = vmatprep.subr.mxu0 %v3041_v0 }
0x1073   :  { %2670 = vmatprep.subr.mxu1 %v3041_v0 }
0x1074   :  { %2671 = vmatpush3.msra.mxu1 %v3178_v27 }
0x1075   :  { %2705 = vmatprep.subr.mxu1 %v3041_v0 }
0x1124   :  { %v1430_v2 = vpop.f32.mrf.mxu1 }
0x1125   :  { %v1434_v3 = vadd.f32 %v1430_v2, %v1361_v1 }
0x1126   :  { %v2655_v19 = vpop.f32.mrf.mxu1 }
0x1127   :  { %2856 = vtanh.f32 %v1434_v3  ;;  %v2317_v24 = vmul.f32 -1.442695, %v1434_v3 }
0x112a   :  { %v1326_v20 = vpop.f32.mrf.mxu0 }
0x112b   :  { %v1327_v21 = vadd.f32 %v3217_v33, %v1326_v20 }
0x112c   :  { %v2644_v22 = vpop.f32.mrf.mxu0 }
0x112d   :  { %2858 = vtanh.f32 %v1327_v21  ;;  %v2315_v26 = vmul.f32 -1.442695, %v1327_v21 }
0x112e   :  { %2860 = vpow2.f32 %v2317_v24 }
0x112f   :  { %2862 = vpow2.f32 %v2315_v26 }
0x1134   :  { %v2857_v4 = vpop.eup %2856 }
0x1135   :  { %1444 = vrot.lane.b32.xlu1 %v2857_v4, %s3043_s3 }
0x113a   :  { %v2859_v23 = vpop.eup %2858 }
0x113b   :  { %1339 = vrot.lane.b32.xlu0 %v2859_v23, %s3043_s3  ;;  %v2861_v27 = vpop.eup %2860 }
0x113c   :  { %v1438_v10 = vadd.f32 1.0, %v2861_v27  ;;  %v2863_v11 = vpop.eup %2862 }
0x113d   :  { %v1333_v12 = vadd.f32 1.0, %v2863_v11 }
0x113e   :  { %2864 = vrcp.f32 %v1438_v10 }
0x113f   :  { %2866 = vrcp.f32 %v1333_v12 }
0x114b   :  { %v2865_v13 = vpop.eup %2864 }
0x114c   :  { %v2867_v16 = vpop.eup %2866  ;;  %v1442_v28 = vmul.f32 %v2865_v13, %v3428_v55  ;;  %v3527_v55 = vld [vmem:[#allocation8 + $0x8] sm:$0xff] }
0x114d   :  { %v1337_v31 = vmul.f32 %v2867_v16, %v3432_v58  ;;  %v1571_v58 = vld [vmem:[#allocation3 + $0xe] sm:$0x3] }
0x11a7   :  { %v1445_v14 = vpop.permute.xlu1 %1444 }
0x11a8   :  { %v1447_v15 = vmul.f32 %v2865_v13, %v1445_v14 }
0x11aa   :  { %1449 = vrot.lane.b32.xlu1 %v1447_v15, %s3037_s11 }
0x11ad   :  { %v1340_v18 = vpop.permute.xlu0 %1339 }
0x11ae   :  { %v1342_v25 = vmul.f32 %v2867_v16, %v1340_v18 }
0x11b0   :  { %1344 = vrot.lane.b32.xlu0 %v1342_v25, %s3037_s11 }
0x121c   :  { %v1450_v29 = vpop.permute.xlu1 %1449 }
0x121d   :  { %v3479_v30 = vadd.f32 %v1450_v29, %v1442_v28 }
0x121f   :  { %2868 = vtanh.f32 %v3479_v30 }
0x1222   :  { %v1345_v32 = vpop.permute.xlu0 %1344 }
0x1223   :  { %v3483_v34 = vadd.f32 %v1345_v32, %v1337_v31 }
0x1225   :  { %2870 = vtanh.f32 %v3483_v34 }
0x122c   :  { %v2869_v35 = vpop.eup %2868 }
0x122d   :  { %1455 = vrot.lane.b32.xlu1 %v2869_v35, %s3043_s3 }
0x1232   :  { %v2871_v36 = vpop.eup %2870 }
0x1233   :  { %1350 = vrot.lane.b32.xlu0 %v2871_v36, %s3043_s3 }
0x129f   :  { %v1456_v37 = vpop.permute.xlu1 %1455 }
0x12a0   :  { %v1458_v39 = vmul.f32 %v2865_v13, %v1456_v37 }
0x12a2   :  { %1460 = vrot.lane.b32.xlu0 %v1458_v39, %s3037_s11 }
0x12a5   :  { %v1351_v40 = vpop.permute.xlu0 %1350 }
0x12a6   :  { %v3489_v41 = vmul.f32 %v2867_v16, %v1351_v40  ;;  %v2924_v40 = vld [vmem:[%s3695_s4] ss:$0 sm:$0xff] }
0x12a8   :  { %1463 = vrot.lane.b32.xlu1 %v3489_v41, %s3043_s3 }
0x1314   :  { %v1461_v42 = vpop.permute.xlu0 %1460 }
0x1315   :  { %2684 = vmatmul.mubr.msk.f32.vlgmr.msra.gmra.mxu0 %vm102_vm1, %v1461_v42 }
0x1316   :  { %2687 = vmatpush3.msra.mxu0 %v3494_v43  ;;  %2702 = vmatprep.mubr.msk.f32.mxu0 %vm3042_vm0, %v3041_v0 }
0x1317   :  { %2688 = vmatprep.subr.mxu0 %v3041_v0 }
0x1318   :  { %2689 = vmatpush3.msra.mxu0 %v3500_v44 }
0x1319   :  { %2690 = vmatprep.subr.mxu0 %v3041_v0 }
0x131a   :  { %2691 = vmatpush3.msra.mxu0 %v3504_v45  ;;  %v1464_v46 = vpop.permute.xlu1 %1463 }
0x131b   :  { %2692 = vmatprep.subr.mxu0 %v3041_v0  ;;  %v1466_v47 = vsel %vm102_vm1, %v1461_v42, %v1464_v46 }
0x131c   :  { %2693 = vmatpush3.msra.mxu0 %v3509_v48  ;;  %2673 = vmatmul.mubr.msk.f32.vlgmr.msra.gmra.mxu1 %vm206_vm2, %v1466_v47 }
0x131d   :  { %2694 = vmatprep.subr.mxu0 %v3041_v0  ;;  %2706 = vmatpush3.msra.mxu1 %v2916_v49 }
0x131e   :  { %2713 = vmatprep.mubr.msk.f32.mxu1 %vm3042_vm0, %v3041_v0  ;;  %2707 = vmatprep.subr.mxu1 %v3041_v0 }
0x131f   :  { %2695 = vmatpush3.msra.mxu0 %v3517_v50  ;;  %2708 = vmatpush3.msra.mxu1 %v2918_v52 }
0x1320   :  { %2696 = vmatprep.subr.mxu0 %v3041_v0  ;;  %2709 = vmatprep.subr.mxu1 %v3041_v0 }
0x1321   :  { %2697 = vmatpush3.msra.mxu0 %v3522_v53  ;;  %2710 = vmatpush3.msra.mxu1 %v2920_v54 }
0x1322   :  { %2698 = vmatprep.subr.mxu0 %v3041_v0  ;;  %2711 = vmatprep.subr.mxu1 %v3041_v0 }
0x1323   :  { %2699 = vmatpush3.msra.mxu0 %v3527_v55  ;;  %2712 = vmatpush3.msra.mxu1 %v2922_v56 }
0x1324   :  { %2700 = vmatprep.subr.mxu0 %v3041_v0  ;;  %2716 = vmatprep.subr.mxu1 %v3041_v0 }
0x1325   :  { %2701 = vmatpush3.msra.mxu0 %v3531_v57 }
0x1326   :  { %2735 = vmatprep.subr.mxu0 %v3041_v0 }
0x13d5   :  { %v1640_v59 = vpop.f32.mrf.mxu0 }
0x13d6   :  { %v1644_v60 = vadd.f32 %v1640_v59, %v1571_v58 }
0x13d7   :  { %v2685_v61 = vpop.f32.mrf.mxu0 }
0x13d8   :  { %2872 = vtanh.f32 %v1644_v60  ;;  %v2321_v1 = vmul.f32 -1.442695, %v1644_v60 }
0x13dc   :  { %v1536_v62 = vpop.f32.mrf.mxu1 }
0x13dd   :  { %v1537_v63 = vadd.f32 %v3217_v33, %v1536_v62 }
0x13de   :  { %v2674_v7 = vpop.f32.mrf.mxu1 }
0x13df   :  { %2874 = vtanh.f32 %v1537_v63  ;;  %v2319_v2 = vmul.f32 -1.442695, %v1537_v63 }
0x13e0   :  { %2876 = vpow2.f32 %v2321_v1 }
0x13e1   :  { %2878 = vpow2.f32 %v2319_v2 }
0x13e5   :  { %v2873_v8 = vpop.eup %2872 }
0x13e6   :  { %1654 = vrot.lane.b32.xlu1 %v2873_v8, %s3043_s3 }
0x13ec   :  { %v2875_v9 = vpop.eup %2874 }
0x13ed   :  { %1549 = vrot.lane.b32.xlu0 %v2875_v9, %s3043_s3  ;;  %v2877_v3 = vpop.eup %2876 }
0x13ee   :  { %v1648_v19 = vadd.f32 1.0, %v2877_v3  ;;  %v2879_v20 = vpop.eup %2878 }
0x13ef   :  { %v1543_v21 = vadd.f32 1.0, %v2879_v20 }
0x13f0   :  { %2880 = vrcp.f32 %v1648_v19 }
0x13f1   :  { %2882 = vrcp.f32 %v1543_v21 }
0x13fd   :  { %v2881_v22 = vpop.eup %2880 }
0x13fe   :  { %v2883_v23 = vpop.eup %2882  ;;  %v1652_v27 = vmul.f32 %v2881_v22, %v3479_v30 }
0x13ff   :  { %v1547_v12 = vmul.f32 %v2883_v23, %v3483_v34  ;;  %v1781_v34 = vld [vmem:[#allocation3 + $0x10] sm:$0x3] }
0x1458   :  { %v1655_v33 = vpop.permute.xlu1 %1654 }
0x1459   :  { %v1657_v4 = vmul.f32 %v2881_v22, %v1655_v33 }
0x145b   :  { %1659 = vrot.lane.b32.xlu1 %v1657_v4, %s3037_s11 }
0x145f   :  { %v1550_v24 = vpop.permute.xlu0 %1549 }
0x1460   :  { %v1552_v26 = vmul.f32 %v2883_v23, %v1550_v24  ;;  %v3044_v24 = vmov 0  }
0x1461   :  { %2766 = vset.pattern.permute.xlu1 %v3044_v24  ;;  %2767 = vset.pattern.permute.xlu0 %v3044_v24 }
0x1462   :  { %1554 = vrot.lane.b32.xlu0 %v1552_v26, %s3037_s11 }
0x14cd   :  { %v1660_v10 = vpop.permute.xlu1 %1659 }
0x14ce   :  { %v3542_v11 = vadd.f32 %v1660_v10, %v1652_v27 }
0x14d0   :  { %2884 = vtanh.f32 %v3542_v11 }
0x14d4   :  { %v1555_v13 = vpop.permute.xlu0 %1554 }
0x14d5   :  { %v3546_v14 = vadd.f32 %v1555_v13, %v1547_v12 }
0x14d7   :  { %2886 = vtanh.f32 %v3546_v14 }
0x14dd   :  { %v2885_v15 = vpop.eup %2884 }
0x14de   :  { %1665 = vrot.lane.b32.xlu1 %v2885_v15, %s3043_s3  ;;  %v3603_v15 = vld [vmem:[%s3691_s0] sm:$0x3] }
0x14df   :  { %vm1991_vm3 = vcmp.gt.s32.totalorder %v3603_v15, 0  ;;  %vm1993_vm4 = vcmp.gt.s32.totalorder %v3603_v15, 2  ;;  %vm1994_vm5 = vcmp.gt.s32.totalorder %v3603_v15, 3  ;;  %vm1996_vm6 = vcmp.gt.s32.totalorder %v3603_v15, 5 }
0x14e0   :  { %vm1998_vm7 = vcmp.gt.s32.totalorder %v3603_v15, 7  ;;  %vm1999_vm8 = vcmp.gt.s32.totalorder %v3603_v15, 8  ;;  %vm1992_vm10 = vcmp.gt.s32.totalorder %v3603_v15, 1  ;;  %vm1995_vm11 = vcmp.gt.s32.totalorder %v3603_v15, 4 }
0x14e1   :  { %vm1997_vm12 = vcmp.gt.s32.totalorder %v3603_v15, 6 }
0x14e4   :  { %v2887_v16 = vpop.eup %2886 }
0x14e5   :  { %1560 = vrot.lane.b32.xlu0 %v2887_v16, %s3043_s3  ;;  %v2009_v16 = vsel %vm1991_vm3, 1, %v3044_v24 }
0x1550   :  { %v1666_v18 = vpop.permute.xlu1 %1665 }
0x1551   :  { %v1668_v25 = vmul.f32 %v2881_v22, %v1666_v18  ;;  %v2011_v18 = vsel %vm1993_vm4, 1, %v3044_v24 }
0x1553   :  { %1670 = vrot.lane.b32.xlu0 %v1668_v25, %s3037_s11  ;;  %v2012_v25 = vsel %vm1994_vm5, 1, %v3044_v24 }
0x1557   :  { %v1561_v28 = vpop.permute.xlu0 %1560 }
0x1558   :  { %v3552_v29 = vmul.f32 %v2883_v23, %v1561_v28  ;;  %v2017_v28 = vsel %vm1999_vm8, 1, %v3044_v24  ;;  %vm2263_vm8 = vcmask 517120  }
0x155a   :  { %1673 = vrot.lane.b32.xlu1 %v3552_v29, %s3043_s3 }
0x15c5   :  { %v1671_v30 = vpop.permute.xlu0 %1670 }
0x15c6   :  { %2714 = vmatmul.mubr.msk.f32.vlgmr.msra.gmra.mxu1 %vm102_vm1, %v1671_v30 }
0x15c7   :  { %2717 = vmatpush3.msra.mxu1 %v3494_v43  ;;  %2732 = vmatprep.mubr.msk.f32.mxu1 %vm3042_vm0, %v3041_v0 }
0x15c8   :  { %2718 = vmatprep.subr.mxu1 %v3041_v0 }
0x15c9   :  { %2719 = vmatpush3.msra.mxu1 %v3500_v44 }
0x15ca   :  { %2720 = vmatprep.subr.mxu1 %v3041_v0 }
0x15cb   :  { %2721 = vmatpush3.msra.mxu1 %v3504_v45 }
0x15cc   :  { %2722 = vmatprep.subr.mxu1 %v3041_v0  ;;  %v1674_v31 = vpop.permute.xlu1 %1673 }
0x15cd   :  { %2723 = vmatpush3.msra.mxu1 %v3509_v48  ;;  %v1676_v32 = vsel %vm102_vm1, %v1671_v30, %v1674_v31 }
0x15ce   :  { %2724 = vmatprep.subr.mxu1 %v3041_v0  ;;  %2703 = vmatmul.mubr.msk.f32.vlgmr.msra.gmra.mxu0 %vm206_vm2, %v1676_v32 }
0x15cf   :  { %2725 = vmatpush3.msra.mxu1 %v3517_v50  ;;  %2743 = vmatprep.mubr.msk.f32.mxu0 %vm3042_vm0, %v3041_v0 }
0x15d0   :  { %2726 = vmatprep.subr.mxu1 %v3041_v0 }
0x15d1   :  { %2727 = vmatpush3.msra.mxu1 %v3522_v53 }
0x15d2   :  { %2728 = vmatprep.subr.mxu1 %v3041_v0 }
0x15d3   :  { %2729 = vmatpush3.msra.mxu1 %v3527_v55 }
0x15d4   :  { %2730 = vmatprep.subr.mxu1 %v3041_v0 }
0x15d5   :  { %2731 = vmatpush3.msra.mxu1 %v3531_v57 }
0x1686   :  { %v1850_v35 = vpop.f32.mrf.mxu1 }
0x1687   :  { %v1854_v36 = vadd.f32 %v1850_v35, %v1781_v34 }
0x1688   :  { %v2715_v37 = vpop.f32.mrf.mxu1 }
0x1689   :  { %2888 = vtanh.f32 %v1854_v36  ;;  %v2325_v46 = vmul.f32 -1.442695, %v1854_v36 }
0x168e   :  { %v1746_v39 = vpop.f32.mrf.mxu0 }
0x168f   :  { %v1747_v42 = vadd.f32 %v2924_v40, %v1746_v39  ;;  %v2066_v39 = vld [vmem:[#allocation9 + $0x18] sm:$0xff] }
0x1690   :  { %v2704_v43 = vpop.f32.mrf.mxu0  ;;  %2736 = vmatpush3.msra.mxu0 %v2066_v39 }
0x1691   :  { %2890 = vtanh.f32 %v1747_v42  ;;  %v2323_v47 = vmul.f32 -1.442695, %v1747_v42  ;;  %2737 = vmatprep.subr.mxu0 %v3041_v0  ;;  %v2065_v42 = vld [vmem:[#allocation9 + $0x10] sm:$0xff] }
0x1692   :  { %2892 = vpow2.f32 %v2325_v46  ;;  %2738 = vmatpush3.msra.mxu0 %v2065_v42  ;;  %v2013_v46 = vsel %vm1995_vm11, 1, %v3044_v24 }
0x1693   :  { %2894 = vpow2.f32 %v2323_v47  ;;  %2739 = vmatprep.subr.mxu0 %v3041_v0  ;;  %v2015_v47 = vsel %vm1997_vm12, 1, %v3044_v24 }
0x1696   :  { %v2889_v44 = vpop.eup %2888 }
0x1697   :  { %1864 = vrot.lane.b32.xlu1 %v2889_v44, %s3043_s3  ;;  %v2064_v44 = vld [vmem:[#allocation9 + $0x8] sm:$0xff] }
0x1698   :  { %2740 = vmatpush3.msra.mxu0 %v2064_v44 }
0x1699   :  { %2741 = vmatprep.subr.mxu0 %v3041_v0 }
0x169e   :  { %v2891_v45 = vpop.eup %2890 }
0x169f   :  { %1759 = vrot.lane.b32.xlu0 %v2891_v45, %s3043_s3  ;;  %v2893_v48 = vpop.eup %2892 }
0x16a0   :  { %v1858_v49 = vadd.f32 1.0, %v2893_v48  ;;  %v2895_v50 = vpop.eup %2894 }
0x16a1   :  { %v1753_v52 = vadd.f32 1.0, %v2895_v50 }
0x16a2   :  { %2896 = vrcp.f32 %v1858_v49 }
0x16a3   :  { %2898 = vrcp.f32 %v1753_v52 }
0x16af   :  { %v2897_v53 = vpop.eup %2896 }
0x16b0   :  { %v2899_v56 = vpop.eup %2898  ;;  %v1862_v59 = vmul.f32 %v2897_v53, %v3542_v11 }
0x16b1   :  { %v1757_v62 = vmul.f32 %v2899_v56, %v3546_v14 }
0x1709   :  { %v1865_v54 = vpop.permute.xlu1 %1864 }
0x170a   :  { %v1867_v55 = vmul.f32 %v2897_v53, %v1865_v54 }
0x170c   :  { %1869 = vrot.lane.b32.xlu1 %v1867_v55, %s3037_s11 }
0x1711   :  { %v1760_v57 = vpop.permute.xlu0 %1759 }
0x1712   :  { %v1762_v58 = vmul.f32 %v2899_v56, %v1760_v57 }
0x1714   :  { %1764 = vrot.lane.b32.xlu0 %v1762_v58, %s3037_s11 }
0x177e   :  { %v1870_v60 = vpop.permute.xlu1 %1869 }
0x177f   :  { %v1872_v61 = vadd.f32 %v1870_v60, %v1862_v59 }
0x1781   :  { %2900 = vtanh.f32 %v1872_v61 }
0x1786   :  { %v1765_v63 = vpop.permute.xlu0 %1764 }
0x1787   :  { %v1767_v7 = vadd.f32 %v1765_v63, %v1757_v62 }
0x1789   :  { %2902 = vtanh.f32 %v1767_v7 }
0x178e   :  { %v2901_v8 = vpop.eup %2900 }
0x178f   :  { %1875 = vrot.lane.b32.xlu1 %v2901_v8, %s3043_s3 }
0x1796   :  { %v2903_v9 = vpop.eup %2902 }
0x1797   :  { %1770 = vrot.lane.b32.xlu0 %v2903_v9, %s3043_s3 }
0x1801   :  { %v1876_v1 = vpop.permute.xlu1 %1875 }
0x1802   :  { %v1878_v2 = vmul.f32 %v2897_v53, %v1876_v1  ;;  %v2088_v53 = vlaneseq }
0x1804   :  { %1880 = vrot.lane.b32.xlu0 %v1878_v2, %s3037_s11  ;;  %v2089_v60 = vshrl.u32 %v2088_v53, 7 }
0x1809   :  { %v1771_v3 = vpop.permute.xlu0 %1770 }
0x180a   :  { %v1773_v19 = vmul.f32 %v2899_v56, %v1771_v3 }
0x180c   :  { %1883 = vrot.lane.b32.xlu1 %v1773_v19, %s3043_s3 }
0x1876   :  { %v1881_v20 = vpop.permute.xlu0 %1880 }
0x187e   :  { %v1884_v21 = vpop.permute.xlu1 %1883 }
0x187f   :  { %v1886_v22 = vsel %vm102_vm1, %v1881_v20, %v1884_v21 }
0x1880   :  { %2733 = vmatmul.mubr.msk.f32.vlgmr.msra.gmra.mxu1 %vm206_vm2, %v1886_v22 }
0x1940   :  { %v1956_v33 = vpop.f32.mrf.mxu1 }
0x1941   :  { %v1957_v4 = vadd.f32 %v2924_v40, %v1956_v33  ;;  %v2010_v40 = vsel %vm1992_vm10, 1, %v3044_v24 }
0x1942   :  { %v2734_v23 = vpop.f32.mrf.mxu1 }
0x1943   :  { %2904 = vtanh.f32 %v1957_v4  ;;  %v2327_v27 = vmul.f32 -1.442695, %v1957_v4 }
0x1945   :  { %2906 = vpow2.f32 %v2327_v27 }
0x1950   :  { %v2905_v26 = vpop.eup %2904 }
0x1951   :  { %1969 = vrot.lane.b32.xlu0 %v2905_v26, %s3043_s3 }
0x1952   :  { %v2907_v10 = vpop.eup %2906 }
0x1953   :  { %v1963_v11 = vadd.f32 1.0, %v2907_v10 }
0x1955   :  { %2908 = vrcp.f32 %v1963_v11 }
0x1962   :  { %v3596_v12 = vpop.eup %2908 }
0x1963   :  { %v1967_v30 = vmul.f32 %v3596_v12, %v1767_v7 }
0x19c3   :  { %v1970_v13 = vpop.permute.xlu0 %1969 }
0x19c4   :  { %v1972_v14 = vmul.f32 %v3596_v12, %v1970_v13 }
0x19c6   :  { %1974 = vrot.lane.b32.xlu1 %v1972_v14, %s3037_s11 }
0x19ca   :  { %305 = vrot.lane.b32.xlu1 %v3233_v6, %s3037_s11  ;;  %v2014_v6 = vsel %vm1996_vm6, 1, %v3044_v24 }
0x19ce   :  { %725 = vrot.lane.b32.xlu1 %v3336_v38, %s3037_s11  ;;  %v2016_v38 = vsel %vm1998_vm7, 1, %v3044_v24 }
0x19d2   :  { %2019 = vperm.xlu1 %2766, %v2009_v16  }
0x19d6   :  { %2025 = vperm.xlu1 %2766, %v2011_v18  }
0x19da   :  { %2028 = vperm.xlu1 %2766, %v2012_v25  }
0x19de   :  { %1355 = vrot.lane.b32.xlu1 %v3489_v41, %s3037_s11 }
0x19e2   :  { %1775 = vrot.lane.b32.xlu1 %v1773_v19, %s3037_s11 }
0x19e6   :  { %2034 = vperm.xlu1 %2766, %v2014_v6  }
0x19ea   :  { %2040 = vperm.xlu1 %2766, %v2016_v38  }
0x19ee   :  { %2043 = vperm.xlu1 %2766, %v2017_v28  }
0x1a38   :  { %v1975_v41 = vpop.permute.xlu1 %1974 }
0x1a39   :  { %v1977_v31 = vadd.f32 %v1975_v41, %v1967_v30 }
0x1a3b   :  { %2910 = vtanh.f32 %v1977_v31 }
0x1a3c   :  { %v306_v32 = vpop.permute.xlu1 %305 }
0x1a3d   :  { %309 = vst.msk [vmem:[#allocation2] sm:$0x3] %vm308_vm9, %v306_v32  ;;  %v2328_v32 = vld [vmem:[%s3697_s6] ss:$0 sm:$0xff]  ;;  %s3046_s6 = smov [#allocation11]  }
0x1a3e   :  { %s2278_s28 = sshll.u32 %s3046_s6, 4  ;;  %s2279_s28 = int_to_ptr.vmem [resolvable:$true] %s2278_s28 }
0x1a3f   :  { %s3005_s29 = scalar_lea.vmem %s2279_s28, 288  ;;  %p3010_p7 = scmp.lt.s32.totalorder %s2279_s28, %s2279_s28 }
0x1a40   :  { %v726_v34 = vpop.permute.xlu1 %725  ;;  %p3006_p6 = scmp.ne.s32.totalorder %s2279_s28, %s3005_s29  ;;  %p3011_p8 = scmp.lt.s32.totalorder %s3005_s29, %s3005_s29 }
0x1a41   :  { %729 = vst.msk [vmem:[#allocation2 + $0x4] sm:$0x3] %vm308_vm9, %v726_v34 }
0x1a42   :  { %p3012_p9 = por %p3011_p8, %p3010_p7 }
0x1a44   :  { %v2000_v62 = vld [vmem:[#allocation2] sm:$0x3]  ;;  %p3013_p10 = pnand %p3012_p9, %p3006_p6 }
0x1a48   :  { %v2911_v35 = vpop.eup %2910  ;;  %v2002_v54 = vld [vmem:[#allocation2 + $0x4] sm:$0x3] }
0x1a49   :  { %1980 = vrot.lane.b32.xlu0 %v2911_v35, %s3043_s3 }
0x1a4d   :  { %v2020_v36 = vpop.permute.xlu1 %2019  ;;  %515 = vrot.lane.b32.xlu0 %v3285_v51, %s3037_s11  ;;  %v2063_v51 = vld [vmem:[#allocation9] sm:$0xff] }
0x1a4e   :  { %2742 = vmatpush3.msra.mxu0 %v2063_v51  ;;  %vm2045_vm15 = vcmp.eq.s32.totalorder %v2020_v36, 1 }
0x1a4f   :  { %v2054_v8 = vsel %vm2045_vm15, %v2000_v62, 0.0 }
0x1a51   :  { %v2026_v37 = vpop.permute.xlu1 %2025  ;;  %935 = vrot.lane.b32.xlu0 %v3387_v17, %s3037_s11 }
0x1a52   :  { %vm2047_vm13 = vcmp.eq.s32.totalorder %v2026_v37, 1 }
0x1a53   :  { %v2056_v56 = vsel %vm2047_vm13, %v2002_v54, 0.0 }
0x1a55   :  { %v2029_v43 = vpop.permute.xlu1 %2028  ;;  %2022 = vperm.xlu0 %2767, %v2010_v40  }
0x1a56   :  { %vm2048_vm14 = vcmp.eq.s32.totalorder %v2029_v43, 1 }
0x1a59   :  { %v1356_v45 = vpop.permute.xlu1 %1355  ;;  %1145 = vrot.lane.b32.xlu0 %v3438_v5, %s3037_s11 }
0x1a5a   :  { %1359 = vst.msk [vmem:[#allocation2 + $0xa] sm:$0x3] %vm308_vm9, %v1356_v45 }
0x1a5d   :  { %v1776_v17 = vpop.permute.xlu1 %1775  ;;  %1565 = vrot.lane.b32.xlu0 %v3552_v29, %s3037_s11  ;;  %v3045_v29 = vmov 1983009808  }
0x1a5e   :  { %1779 = vst.msk [vmem:[#allocation2 + $0xe] sm:$0x3] %vm308_vm9, %v1776_v17  ;;  %v2086_v52 = vunpack.c.l.s4 %v3045_v29 }
0x1a60   :  { %v2087_v59 = vunpack.c.0.s8 %v2086_v52 }
0x1a61   :  { %2031 = vperm.xlu0 %2767, %v2013_v46   ;;  %v2035_v20 = vpop.permute.xlu1 %2034  ;;  %v2005_v24 = vld [vmem:[#allocation2 + $0xa] sm:$0x3] }
0x1a62   :  { %v3651_v7 = vsub.s32 %v2087_v59, %v2089_v60  ;;  %vm2050_vm3 = vcmp.eq.s32.totalorder %v2035_v20, 1 }
0x1a63   :  { %v2059_v10 = vsel %vm2050_vm3, %v2005_v24, 0.0 }
0x1a65   :  { %2037 = vperm.xlu0 %2767, %v2015_v47   ;;  %v2041_v33 = vpop.permute.xlu1 %2040  ;;  %v2007_v27 = vld [vmem:[#allocation2 + $0xe] sm:$0x3] }
0x1a66   :  { %vm2052_vm5 = vcmp.eq.s32.totalorder %v2041_v33, 1 }
0x1a67   :  { %v2061_v14 = vsel %vm2052_vm5, %v2007_v27, 0.0 }
0x1a69   :  { %v2044_v28 = vpop.permute.xlu1 %2043 }
0x1a6a   :  { %vm2053_vm7 = vcmp.eq.s32.totalorder %v2044_v28, 1 }
0x1abb   :  { %v1981_v48 = vpop.permute.xlu0 %1980 }
0x1abc   :  { %v1983_v5 = vmul.f32 %v3596_v12, %v1981_v48 }
0x1abe   :  { %1985 = vrot.lane.b32.xlu0 %v1983_v5, %s3037_s11 }
0x1abf   :  { %v516_v49 = vpop.permute.xlu0 %515 }
0x1ac0   :  { %519 = vst.msk [vmem:[#allocation2 + $0x2] sm:$0x3] %vm308_vm9, %v516_v49 }
0x1ac3   :  { %v936_v50 = vpop.permute.xlu0 %935 }
0x1ac4   :  { %939 = vst.msk [vmem:[#allocation2 + $0x6] sm:$0x3] %vm308_vm9, %v936_v50 }
0x1ac7   :  { %v2001_v63 = vld [vmem:[#allocation2 + $0x2] sm:$0x3] }
0x1acb   :  { %v2003_v55 = vld [vmem:[#allocation2 + $0x6] sm:$0x3] }
0x1acc   :  { %v2057_v57 = vsel %vm2048_vm14, %v2003_v55, 0.0 }
0x1acd   :  { %v2084_v58 = vcombine.low %v2056_v56, %v2057_v57 }
0x1acf   :  { %v2098_v3 = vrot.slane %v2084_v58, %v3651_v7 }
0x1ad0   :  { %v2023_v61 = vpop.permute.xlu0 %2022 }
0x1ad1   :  { %vm2046_vm2 = vcmp.eq.s32.totalorder %v2023_v61, 1 }
0x1ad2   :  { %v2055_v9 = vsel %vm2046_vm2, %v2001_v63, 0.0 }
0x1ad3   :  { %v2083_v1 = vcombine.low %v2054_v8, %v2055_v9 }
0x1ad4   :  { %v1146_v2 = vpop.permute.xlu0 %1145 }
0x1ad5   :  { %v2091_v19 = vrot.slane %v2083_v1, %v3651_v7  ;;  %1149 = vst.msk [vmem:[#allocation2 + $0x8] sm:$0x3] %vm308_vm9, %v1146_v2 }
0x1ad7   :  { %v2099_v21 = vcombine.low %v2091_v19, %v2098_v3 }
0x1ad8   :  { %v1566_v22 = vpop.permute.xlu0 %1565 }
0x1ad9   :  { %1569 = vst.msk [vmem:[#allocation2 + $0xc] sm:$0x3] %vm308_vm9, %v1566_v22  ;;  %2744 = vmatmul.mubr.msk.f32.vlgmr.msra.gmra.mxu0 %vm102_vm1, %v2099_v21 }
0x1ada   :  { %2746 = vmatprep.mubr.msk.f32.mxu0 %vm3042_vm0, %v3041_v0 }
0x1adc   :  { %v2004_v4 = vld [vmem:[#allocation2 + $0x8] sm:$0x3]  ;;  %v2032_v23 = vpop.permute.xlu0 %2031 }
0x1add   :  { %vm2049_vm4 = vcmp.eq.s32.totalorder %v2032_v23, 1 }
0x1ade   :  { %v2058_v26 = vsel %vm2049_vm4, %v2004_v4, 0.0 }
0x1adf   :  { %v2100_v13 = vcombine.low %v2058_v26, %v2059_v10 }
0x1ae0   :  { %v2006_v11 = vld [vmem:[#allocation2 + $0xc] sm:$0x3]  ;;  %v2038_v12 = vpop.permute.xlu0 %2037 }
0x1ae1   :  { %vm2051_vm6 = vcmp.eq.s32.totalorder %v2038_v12, 1  ;;  %v2108_v18 = vrot.slane %v2100_v13, %v3651_v7 }
0x1ae2   :  { %v2060_v15 = vsel %vm2051_vm6, %v2006_v11, 0.0 }
0x1ae3   :  { %v2101_v16 = vcombine.low %v2060_v15, %v2061_v14 }
0x1ae5   :  { %v2115_v25 = vrot.slane %v2101_v16, %v3651_v7 }
0x1ae7   :  { %v2116_v6 = vcombine.low %v2108_v18, %v2115_v25 }
0x1ae9   :  { %2747 = vmatmul.mubr.msk.f32.gmra.mxu0 %vm102_vm1, %v2116_v6 }
0x1aea   :  { %2749 = vmatprep.mubr.msk.f32.mxu0 %vm3042_vm0, %v3041_v0 }
0x1b30   :  { %v1986_v38 = vpop.permute.xlu0 %1985 }
0x1b31   :  { %1989 = vst.msk [vmem:[#allocation2 + $0x10] sm:$0x3] %vm308_vm9, %v1986_v38 }
0x1b38   :  { %v2008_v30 = vld [vmem:[#allocation2 + $0x10] sm:$0x3] }
0x1b39   :  { %v2062_v41 = vsel %vm2053_vm7, %v2008_v30, 0.0 }
0x1b3a   :  { %v2123_v31 = vrot.slane %v2062_v41, %v3651_v7 }
0x1b3c   :  { %2750 = vmatmul.mubr.msk.f32.gmra.mxu0 %vm102_vm1, %v2123_v31 }
0x1b99   :  { %v2196_v34 = vpop.f32.mrf.mxu0 }
0x1b9a   :  { %v2197_v35 = vadd.f32 %v2328_v32, %v2196_v34 }
0x1b9b   :  { %v2745_v36 = vpop.f32.mrf.mxu0 }
0x1b9c   :  { %v2213_v0 = vcombine.high %v2197_v35, %v2197_v35  ;;  %v2220_v37 = vrot.slane %v2197_v35, %v3651_v7 }
0x1b9e   :  { %v2227_v39 = vrot.slane %v2213_v0, %v3651_v7  ;;  %v2228_v40 = vcombine.high %v2220_v37, %v2220_v37  ;;  %2264 = vst.msk [vmem:[#allocation11] sm:$0x3] %vm2263_vm8, %v2220_v37 }
0x1ba0   :  { %v2229_v42 = vcombine.high %v2227_v39, %v2227_v39  ;;  %2265 = vst.msk [vmem:[#allocation11 + $0x2] sm:$0x3] %vm2263_vm8, %v2228_v40  ;;  %2266 = vst.msk [vmem:[#allocation11 + $0x4] sm:$0x3] %vm2263_vm8, %v2227_v39 }
0x1ba2   :  { %2267 = vst.msk [vmem:[#allocation11 + $0x6] sm:$0x3] %vm2263_vm8, %v2229_v42 }
0x1ba9   :  { %v2201_v43 = vpop.f32.mrf.mxu0 }
0x1baa   :  { %v2202_v44 = vadd.f32 %v2328_v32, %v2201_v43 }
0x1bab   :  { %v2748_v51 = vpop.f32.mrf.mxu0 }
0x1bac   :  { %v2230_v45 = vcombine.high %v2202_v44, %v2202_v44  ;;  %v2237_v17 = vrot.slane %v2202_v44, %v3651_v7 }
0x1bae   :  { %v2244_v46 = vrot.slane %v2230_v45, %v3651_v7  ;;  %v2245_v47 = vcombine.high %v2237_v17, %v2237_v17  ;;  %2268 = vst.msk [vmem:[#allocation11 + $0x8] sm:$0x3] %vm2263_vm8, %v2237_v17 }
0x1bb0   :  { %v2246_v48 = vcombine.high %v2244_v46, %v2244_v46  ;;  %2269 = vst.msk [vmem:[#allocation11 + $0xa] sm:$0x3] %vm2263_vm8, %v2245_v47  ;;  %2270 = vst.msk [vmem:[#allocation11 + $0xc] sm:$0x3] %vm2263_vm8, %v2244_v46 }
0x1bb2   :  { %2271 = vst.msk [vmem:[#allocation11 + $0xe] sm:$0x3] %vm2263_vm8, %v2246_v48 }
0x1bfc   :  { %v2206_v5 = vpop.f32.mrf.mxu0 }
0x1bfd   :  { %v2207_v49 = vadd.f32 %v2328_v32, %v2206_v5 }
0x1bfe   :  { %v2751_v50 = vpop.f32.mrf.mxu0 }
0x1bff   :  { %v2253_v29 = vrot.slane %v2207_v49, %v3651_v7 }
0x1c01   :  { %2272 = vst.msk [vmem:[#allocation11 + $0x10] sm:$0x3] %vm2263_vm8, %v2253_v29 }
0x1c02   :  { %3016 = shalt.err (!%p3013_p10)
}
0x1c03   :  { %2284 = dma.vmem_to_hbm [thread:$0]  %s2279_s28, 288, %s3698_s7, [#allocation5], %s3037_s11, %s3037_s11, %s3038_s12  }
0x1c04   :  { %3031 = dma.done.wait [#allocation5], 288  }
0x1c05   :  { %3032 = vsyncadd [#allocation5], 4294967008 }
0x1c06   :  { %2288 = vsyncpa [#allocation4], 1 }
0x1c07   :  { %2289 = vsyncpa [#allocation7], 1 }
0x1c08   :  { %2290 = vsyncpa [#allocation10], 1 }
0x1c09   :  { %2291 = vsyncpa [#allocation5], 1 }

</bundles_post_ra>
